<compile_context>
chip_gen: v5e
topology: v5e:2x2
jax: 0.10.0
libtpu: 0.0.40
codegen_flags: <defaults>
</compile_context>

<pallas_src>
import functools
import math

import jax
import jax.numpy as jnp
from jax.experimental import pallas as pl
from jax.experimental.pallas import tpu as pltpu


# ----------------------------- in-kernel helpers ----------------------------

def _layernorm(x, g, b):
    # x: (M, D) f32, g/b: (1, D) f32. eps = 1e-5 (PyTorch default).
    mu = jnp.mean(x, axis=-1, keepdims=True)
    xc = x - mu
    var = jnp.mean(xc * xc, axis=-1, keepdims=True)
    return xc * jax.lax.rsqrt(var + 1e-5) * g + b


def _mha(q2d, k2d, v2d, B, Sq, Sk, nhead, Dh, scale, mxu_dtype):
    """Multi-head attention, all batches batched in one 3-D einsum per head.

    q2d: (B*Sq, D) f32, k2d/v2d: (B*Sk, D) f32 or bf16 -> (B*Sq, D) f32.
    Q/K/V are cast to the MXU dtype ONCE up front (no per-head casts).
    """
    D = nhead * Dh
    q3 = (q2d * scale).astype(mxu_dtype).reshape(B, Sq, D)
    k3 = k2d.astype(mxu_dtype).reshape(B, Sk, D)
    v3 = v2d.astype(mxu_dtype).reshape(B, Sk, D)
    outs = []
    for h in range(nhead):
        lo, hi = h * Dh, (h + 1) * Dh
        s = jnp.einsum("bqd,bkd->bqk", q3[:, :, lo:hi], k3[:, :, lo:hi],
                       preferred_element_type=jnp.float32)      # (B, Sq, Sk)
        m = jnp.max(s, axis=-1, keepdims=True)
        p = jnp.exp(s - m)
        denom = jnp.sum(p, axis=-1, keepdims=True)
        # NOTE: approx reciprocal (~2^-12 rel. error) — fine for inference.
        p = p * pl.reciprocal(denom, approx=True)
        outs.append(jnp.einsum("bqk,bkd->bqd", p.astype(mxu_dtype), v3[:, :, lo:hi],
                               preferred_element_type=jnp.float32))
    return jnp.concatenate(outs, axis=-1).reshape(B * Sq, D)


# ------------------------------ fused kernel --------------------------------

def _decoder_kernel(
    tgt_ref, qpos_ref, mem_ref, memp_ref,
    wqkv_s_ref, bqkv_s_ref, wo_s_ref, bo_s_ref,
    wqkv_c_ref, bqkv_c_ref, wo_c_ref, bo_c_ref,
    w1_ref, b1_ref, w2_ref, b2_ref,
    ln_ref, fln_ref,
    out_ref,
    x_scr,
    *, nhead, BT, S_tgt, S_mem, D, mxu_dtype):
    """One grid step == one decoder layer for one batch tile.

    x_scr is the f32 VMEM-resident residual stream; out_ref is written only on
    the last layer (after the decoder's final LayerNorm).
    """
    layer = pl.program_id(1)
    last = pl.num_programs(1) - 1
    Dh = D // nhead
    scale = 1.0 / math.sqrt(Dh)

    # Initialize the resident f32 activation from the input tgt on layer 0.
    @pl.when(layer == 0)
    def _():
        x_scr[...] = tgt_ref[...].astype(jnp.float32)

    x = x_scr[...]                                   # (BT*S_tgt, D) f32
    qpos = qpos_ref[...].astype(jnp.float32)
    ln = ln_ref[0]                                   # (6, D) f32: g1,b1,g2,b2,g3,b3

    def dot_bf(a_bf, w_bf, b_f32):
        # MXU matmul (bf16 x bf16) with f32 accumulation + f32 bias epilogue.
        return jnp.dot(a_bf, w_bf, preferred_element_type=jnp.float32) + b_f32

    # ---------------- self attention: q = k = x + qpos, v = x ----------------
    wqkv = wqkv_s_ref[0]                             # (D, 3D) bf16: [Wq.T|Wk.T|Wv.T]
    bqkv = bqkv_s_ref[0]                             # (1, 3D) f32
    xq_bf = (x + qpos).astype(mxu_dtype)             # cast once, reused for Q|K
    x_bf = x.astype(mxu_dtype)                       # cast once, value path
    qk = dot_bf(xq_bf, wqkv[:, :2 * D], bqkv[:, :2 * D])   # merged Q|K projection
    v = dot_bf(x_bf, wqkv[:, 2 * D:], bqkv[:, 2 * D:])
    att = _mha(qk[:, :D], qk[:, D:], v, BT, S_tgt, S_tgt, nhead, Dh, scale, mxu_dtype)
    o = dot_bf(att.astype(mxu_dtype), wo_s_ref[0], bo_s_ref[0])
    x = _layernorm(x + o, ln[0:1], ln[1:2])

    # ------- cross attention: q = x + qpos, k = memory + pos, v = memory ------
    wqkv = wqkv_c_ref[0]
    bqkv = bqkv_c_ref[0]
    xq_bf = (x + qpos).astype(mxu_dtype)
    q = dot_bf(xq_bf, wqkv[:, :D], bqkv[:, :D])
    k = dot_bf(memp_ref[...], wqkv[:, D:2 * D], bqkv[:, D:2 * D])   # memp already bf16
    v = dot_bf(mem_ref[...], wqkv[:, 2 * D:], bqkv[:, 2 * D:])      # mem already bf16
    att = _mha(q, k, v, BT, S_tgt, S_mem, nhead, Dh, scale, mxu_dtype)
    o = dot_bf(att.astype(mxu_dtype), wo_c_ref[0], bo_c_ref[0])
    x = _layernorm(x + o, ln[2:3], ln[3:4])

    # ------------------------------ feed-forward ------------------------------
    x_bf = x.astype(mxu_dtype)
    h = jnp.maximum(dot_bf(x_bf, w1_ref[0], b1_ref[0]), 0.0)
    o = dot_bf(h.astype(mxu_dtype), w2_ref[0], b2_ref[0])   # hidden fed bf16
    x = _layernorm(x + o, ln[4:5], ln[5:6])

    # Residual stream stays resident in f32 scratch across layers.
    x_scr[...] = x

    # Final LayerNorm + single cast/store of the result on the last layer only.
    @pl.when(layer == last)
    def _():
        fln = fln_ref[...]                           # (2, D) f32: gamma, beta
        out_ref[...] = _layernorm(x, fln[0:1], fln[1:2]).astype(out_ref.dtype)


# ------------------------------- Model glue ---------------------------------

def transformer_decoder_forward(tgt, memory, packed, *, nhead,
                                tgt_mask=None, memory_mask=None,
                                tgt_key_padding_mask=None,
                                memory_key_padding_mask=None,
                                pos=None, query_pos=None):
    # TODO(synk): attention / key-padding masks are None in this configuration
    # and are not implemented in the fused kernel — fail loudly if provided.
    if (tgt_mask is not None or memory_mask is not None
            or tgt_key_padding_mask is not None
            or memory_key_padding_mask is not None):
        raise NotImplementedError("masks are not supported by this Pallas kernel")

    S, B, D = tgt.shape
    Smem = memory.shape[0]
    L = packed["w_qkv_self"].shape[0]
    F = packed["w1"].shape[2]
    w_dtype = packed["w_qkv_self"].dtype

    if pos is None:
        pos = jnp.zeros_like(memory)
    if query_pos is None:
        query_pos = jnp.zeros_like(tgt)

    # Batch tiling for the "parallel" grid axis (v7x has 2 TensorCores; on
    # single-TC v5e/v6e this is just a loop). Batches are independent here.
    n_bt = 2 if (B % 2 == 0 and B >= 2) else 1
    BT = B // n_bt

    # One-time layout change: batch-major, token-flattened lane-dense 2-D slabs.
    tgt2d = tgt.transpose(1, 0, 2).reshape(B * S, D)
    qpos2d = query_pos.transpose(1, 0, 2).reshape(B * S, D)
    # The memory slabs only ever feed MXU matmuls -> carry them in the MXU
    # dtype (bf16): half the HBM->VMEM DMA / VMEM residency, no in-kernel casts.
    mem2d = memory.transpose(1, 0, 2).reshape(B * Smem, D).astype(w_dtype)
    memp2d = (memory + pos).transpose(1, 0, 2).reshape(B * Smem, D).astype(w_dtype)

    act2 = lambda b, l: (b, 0)        # activation slabs: indexed by batch tile
    layer3 = lambda b, l: (l, 0, 0)   # stacked per-layer weights
    const2 = lambda b, l: (0, 0)      # final LayerNorm params

    kernel = functools.partial(
        _decoder_kernel, nhead=nhead, BT=BT, S_tgt=S, S_mem=Smem, D=D,
        mxu_dtype=w_dtype)

    # --- explicit VMEM budget (v5e's 16 MiB default scoped limit is a wall at
    #     real DETR shapes); generous estimate, clamped to the v7x 64 MiB tier.
    bpe_w = jnp.dtype(w_dtype).itemsize
    act_bytes = 2 * (BT * S * D * 4) + 2 * (BT * Smem * D * bpe_w)
    wt_bytes = (2 * (D * 3 * D + D * D) + D * F + F * D) * bpe_w \
        + (2 * (3 * D + D) + F + D + 6 * D + 2 * D) * 4
    out_bytes = BT * S * D * tgt.dtype.itemsize
    scratch_bytes = BT * S * D * 4
    interm_bytes = BT * S * max(S, Smem) * 4 + BT * S * F * 4 + 4 * BT * S * D * 4
    est = 2 * (act_bytes + wt_bytes) + 2 * out_bytes + scratch_bytes + interm_bytes
    vmem_limit = int(min(max(2 * est, 32 << 20), 60 << 20))

    # --- advisory cost estimate so XLA schedules around this long fused call.
    T, Mt = B * S, B * Smem
    flops_layer = 2 * (T * D * 3 * D + T * D * D                 # self proj
                       + T * D * D + Mt * D * 2 * D + T * D * D  # cross proj
                       + T * D * F + T * F * D)                  # FFN
    flops_layer += 4 * B * S * S * D + 4 * B * S * Smem * D      # attention matmuls
    flops = int(L * flops_layer)
    transcendentals = int(L * B * nhead * (S * S + S * Smem))    # softmax exps
    bytes_accessed = int(
        sum(a.size * a.dtype.itemsize for a in (tgt2d, qpos2d, mem2d, memp2d))
        + sum(v.size * v.dtype.itemsize for v in packed.values())
        + T * D * tgt.dtype.itemsize)

    out2d = pl.pallas_call(
        kernel,
        out_shape=jax.ShapeDtypeStruct((B * S, D), tgt.dtype),
        grid_spec=pltpu.PrefetchScalarGridSpec(
            num_scalar_prefetch=0,
            grid=(n_bt, L),
            in_specs=[
                pl.BlockSpec((BT * S, D), act2),         # tgt (init only)
                pl.BlockSpec((BT * S, D), act2),         # query_pos
                pl.BlockSpec((BT * Smem, D), act2),      # memory (bf16)
                pl.BlockSpec((BT * Smem, D), act2),      # memory + pos (bf16)
                pl.BlockSpec((1, D, 3 * D), layer3),     # self in_proj W (pre-T)
                pl.BlockSpec((1, 1, 3 * D), layer3),     # self in_proj b
                pl.BlockSpec((1, D, D), layer3),         # self out_proj W (pre-T)
                pl.BlockSpec((1, 1, D), layer3),         # self out_proj b
                pl.BlockSpec((1, D, 3 * D), layer3),     # cross in_proj W (pre-T)
                pl.BlockSpec((1, 1, 3 * D), layer3),     # cross in_proj b
                pl.BlockSpec((1, D, D), layer3),         # cross out_proj W (pre-T)
                pl.BlockSpec((1, 1, D), layer3),         # cross out_proj b
                pl.BlockSpec((1, D, F), layer3),         # linear1 W (pre-T)
                pl.BlockSpec((1, 1, F), layer3),         # linear1 b
                pl.BlockSpec((1, F, D), layer3),         # linear2 W (pre-T)
                pl.BlockSpec((1, 1, D), layer3),         # linear2 b
                pl.BlockSpec((1, 6, D), layer3),         # norm1/2/3 gamma+beta
                pl.BlockSpec((2, D), const2),            # final norm gamma+beta
            ],
            out_specs=pl.BlockSpec((BT * S, D), act2),   # written on last layer only
            scratch_shapes=[pltpu.VMEM((BT * S, D), jnp.float32)],  # residual stream
        ),
        compiler_params=pltpu.CompilerParams(
            dimension_semantics=("parallel", "arbitrary"),
            vmem_limit_bytes=vmem_limit),
        cost_estimate=pl.CostEstimate(
            flops=flops, transcendentals=transcendentals,
            bytes_accessed=bytes_accessed),
    )(tgt2d, qpos2d, mem2d, memp2d,
      packed["w_qkv_self"], packed["b_qkv_self"],
      packed["w_o_self"], packed["b_o_self"],
      packed["w_qkv_cross"], packed["b_qkv_cross"],
      packed["w_o_cross"], packed["b_o_cross"],
      packed["w1"], packed["b1"], packed["w2"], packed["b2"],
      packed["ln"], packed["final_ln"])

    out = out2d.reshape(B, S, D).transpose(1, 0, 2)   # back to (S, B, D)
    return out[None]                                  # .unsqueeze(0)


# ---------------------------- Parameter creation ----------------------------

def make_params(key, num_layers, d_model, nhead, dim_ff, dtype=jnp.float32):
    """PyTorch-layout parameters (nn.MultiheadAttention / nn.Linear conventions)."""
    def nrm(k, shape, scale=0.02):
        return (scale * jax.random.normal(k, shape)).astype(dtype)

    def mha_params(k):
        k1, k2 = jax.random.split(k)
        return {
            "in_proj_w": nrm(k1, (3 * d_model, d_model)),
            "in_proj_b": jnp.zeros((3 * d_model,), dtype),
            "out_proj_w": nrm(k2, (d_model, d_model)),
            "out_proj_b": jnp.zeros((d_model,), dtype),
        }

    def ln_params():
        return {"gamma": jnp.ones((d_model,), dtype),
                "beta": jnp.zeros((d_model,), dtype)}

    layers = []
    for lk in jax.random.split(key, num_layers):
        k1, k2, k3, k4 = jax.random.split(lk, 4)
        layers.append({
            "self_attn": mha_params(k1),
            "cross_attn": mha_params(k2),
            "lin1_w": nrm(k3, (dim_ff, d_model)),
            "lin1_b": jnp.zeros((dim_ff,), dtype),
            "lin2_w": nrm(k4, (d_model, dim_ff)),
            "lin2_b": jnp.zeros((d_model,), dtype),
            "norm1": ln_params(), "norm2": ln_params(), "norm3": ln_params(),
        })
    return {"layers": layers, "final_norm": ln_params()}


def pack_params(params, w_dtype=jnp.bfloat16):
    """One-time conversion: transpose weights, stack layers, pack LayerNorms."""
    layers = params["layers"]
    f32 = jnp.float32

    def stack(fn, dtype):
        return jnp.stack([fn(p) for p in layers], axis=0).astype(dtype)

    return {
        "w_qkv_self": stack(lambda p: p["self_attn"]["in_proj_w"].T, w_dtype),
        "b_qkv_self": stack(lambda p: p["self_attn"]["in_proj_b"][None, :], f32),
        "w_o_self":   stack(lambda p: p["self_attn"]["out_proj_w"].T, w_dtype),
        "b_o_self":   stack(lambda p: p["self_attn"]["out_proj_b"][None, :], f32),
        "w_qkv_cross": stack(lambda p: p["cross_attn"]["in_proj_w"].T, w_dtype),
        "b_qkv_cross": stack(lambda p: p["cross_attn"]["in_proj_b"][None, :], f32),
        "w_o_cross":   stack(lambda p: p["cross_attn"]["out_proj_w"].T, w_dtype),
        "b_o_cross":   stack(lambda p: p["cross_attn"]["out_proj_b"][None, :], f32),
        "w1": stack(lambda p: p["lin1_w"].T, w_dtype),
        "b1": stack(lambda p: p["lin1_b"][None, :], f32),
        "w2": stack(lambda p: p["lin2_w"].T, w_dtype),
        "b2": stack(lambda p: p["lin2_b"][None, :], f32),
        "ln": stack(lambda p: jnp.stack([
            p["norm1"]["gamma"], p["norm1"]["beta"],
            p["norm2"]["gamma"], p["norm2"]["beta"],
            p["norm3"]["gamma"], p["norm3"]["beta"]], axis=0), f32),
        "final_ln": jnp.stack([params["final_norm"]["gamma"],
                               params["final_norm"]["beta"]], axis=0).astype(f32),
    }


# ---------------------------------- Main -------------------------------------

if __name__ == "__main__":
    d_model = 32
    nhead = 4
    dim_ff = 64
    num_layers = 2
    num_queries = 8    # tgt sequence length
    mem_len = 16       # memory sequence length (e.g. H*W of encoder features)
    batch = 2

    root = jax.random.PRNGKey(0)
    k_p, k_t, k_m, k_pos, k_qp = jax.random.split(root, 5)

    params = make_params(k_p, num_layers, d_model, nhead, dim_ff)
    packed = pack_params(params, w_dtype=jnp.bfloat16)

    tgt = jax.random.normal(k_t, (num_queries, batch, d_model), jnp.float32)
    memory = jax.random.normal(k_m, (mem_len, batch, d_model), jnp.float32)
    pos = jax.random.normal(k_pos, (mem_len, batch, d_model), jnp.float32)
    query_pos = jax.random.normal(k_qp, (num_queries, batch, d_model), jnp.float32)

    fwd = jax.jit(transformer_decoder_forward, static_argnames=("nhead",))
    out = fwd(tgt, memory, packed, nhead=nhead, pos=pos, query_pos=query_pos)
    out = jax.block_until_ready(out)

    assert out.shape == (1, num_queries, batch, d_model), out.shape
    assert bool(jnp.all(jnp.isfinite(out)))
    print("KERNEL_OK")
</pallas_src>

<mosaic_0001>
module attributes {stable_mosaic.version = 11 : i64} {
  func.func @_decoder_kernel(%arg0: i32, %arg1: i32, %arg2: memref<8x32xf32, #tpu.memory_space<vmem>>, %arg3: memref<8x32xf32, #tpu.memory_space<vmem>>, %arg4: memref<16x32xbf16, #tpu.memory_space<vmem>>, %arg5: memref<16x32xbf16, #tpu.memory_space<vmem>>, %arg6: memref<1x32x96xbf16, #tpu.memory_space<vmem>>, %arg7: memref<1x1x96xf32, #tpu.memory_space<vmem>>, %arg8: memref<1x32x32xbf16, #tpu.memory_space<vmem>>, %arg9: memref<1x1x32xf32, #tpu.memory_space<vmem>>, %arg10: memref<1x32x96xbf16, #tpu.memory_space<vmem>>, %arg11: memref<1x1x96xf32, #tpu.memory_space<vmem>>, %arg12: memref<1x32x32xbf16, #tpu.memory_space<vmem>>, %arg13: memref<1x1x32xf32, #tpu.memory_space<vmem>>, %arg14: memref<1x32x64xbf16, #tpu.memory_space<vmem>>, %arg15: memref<1x1x64xf32, #tpu.memory_space<vmem>>, %arg16: memref<1x64x32xbf16, #tpu.memory_space<vmem>>, %arg17: memref<1x1x32xf32, #tpu.memory_space<vmem>>, %arg18: memref<1x6x32xf32, #tpu.memory_space<vmem>>, %arg19: memref<2x32xf32, #tpu.memory_space<vmem>>, %arg20: memref<8x32xf32, #tpu.memory_space<vmem>>, %arg21: memref<8x32xf32, #tpu.memory_space<vmem>>) attributes {dimension_semantics = [#tpu.dimension_semantics<parallel>, #tpu.dimension_semantics<arbitrary>], iteration_bounds = array<i64: 2, 2>, scalar_prefetch = 0 : i64, scratch_operands = 1 : i64, tpu.core_type = #tpu.core_type<tc>, window_params = [{transform_indices = @transform_0, window_bounds = array<i64: 8, 32>}, {transform_indices = @transform_1, window_bounds = array<i64: 8, 32>}, {transform_indices = @transform_2, window_bounds = array<i64: 16, 32>}, {transform_indices = @transform_3, window_bounds = array<i64: 16, 32>}, {transform_indices = @transform_4, window_bounds = array<i64: 1, 32, 96>}, {transform_indices = @transform_5, window_bounds = array<i64: 1, 1, 96>}, {transform_indices = @transform_6, window_bounds = array<i64: 1, 32, 32>}, {transform_indices = @transform_7, window_bounds = array<i64: 1, 1, 32>}, {transform_indices = @transform_8, window_bounds = array<i64: 1, 32, 96>}, {transform_indices = @transform_9, window_bounds = array<i64: 1, 1, 96>}, {transform_indices = @transform_10, window_bounds = array<i64: 1, 32, 32>}, {transform_indices = @transform_11, window_bounds = array<i64: 1, 1, 32>}, {transform_indices = @transform_12, window_bounds = array<i64: 1, 32, 64>}, {transform_indices = @transform_13, window_bounds = array<i64: 1, 1, 64>}, {transform_indices = @transform_14, window_bounds = array<i64: 1, 64, 32>}, {transform_indices = @transform_15, window_bounds = array<i64: 1, 1, 32>}, {transform_indices = @transform_16, window_bounds = array<i64: 1, 6, 32>}, {pipeline_mode = #tpu.pipeline_mode<synchronous>, transform_indices = @transform_17, window_bounds = array<i64: 2, 32>}, {transform_indices = @transform_18, window_bounds = array<i64: 8, 32>}]} {
    %c0_i32 = arith.constant 0 : i32
    %0 = arith.cmpi eq, %arg1, %c0_i32 : i32
    %1 = arith.extui %0 : i1 to i32
    %c0_i32_0 = arith.constant 0 : i32
    %2 = arith.cmpi ne, %1, %c0_i32_0 : i32
    scf.if %2 {
      %c0_108 = arith.constant 0 : index
      %c0_109 = arith.constant 0 : index
      %304 = vector.load %arg2[%c0_108, %c0_109] : memref<8x32xf32, #tpu.memory_space<vmem>>, vector<8x32xf32>
      %c0_110 = arith.constant 0 : index
      %c0_111 = arith.constant 0 : index
      %305 = vector.load %arg21[%c0_110, %c0_111] : memref<8x32xf32, #tpu.memory_space<vmem>>, vector<8x32xf32>
      tpu.vector_store %arg21[%c0_110, %c0_111], %304 {strides = array<i32>} : memref<8x32xf32, #tpu.memory_space<vmem>>, vector<8x32xf32>,
    } else {
    }
    %c0 = arith.constant 0 : index
    %c0_1 = arith.constant 0 : index
    %3 = vector.load %arg21[%c0, %c0_1] : memref<8x32xf32, #tpu.memory_space<vmem>>, vector<8x32xf32>
    %c0_2 = arith.constant 0 : index
    %c0_3 = arith.constant 0 : index
    %4 = vector.load %arg3[%c0_2, %c0_3] : memref<8x32xf32, #tpu.memory_space<vmem>>, vector<8x32xf32>
    %c0_4 = arith.constant 0 : index
    %c0_5 = arith.constant 0 : index
    %c0_6 = arith.constant 0 : index
    %5 = vector.load %arg18[%c0_4, %c0_5, %c0_6] : memref<1x6x32xf32, #tpu.memory_space<vmem>>, vector<1x6x32xf32>
    %6 = vector.shape_cast %5 : vector<1x6x32xf32> to vector<6x32xf32>
    %c0_7 = arith.constant 0 : index
    %c0_8 = arith.constant 0 : index
    %c0_9 = arith.constant 0 : index
    %7 = vector.load %arg6[%c0_7, %c0_8, %c0_9] : memref<1x32x96xbf16, #tpu.memory_space<vmem>>, vector<1x32x96xbf16>
    %8 = vector.shape_cast %7 : vector<1x32x96xbf16> to vector<32x96xbf16>
    %c0_10 = arith.constant 0 : index
    %c0_11 = arith.constant 0 : index
    %c0_12 = arith.constant 0 : index
    %9 = vector.load %arg7[%c0_10, %c0_11, %c0_12] : memref<1x1x96xf32, #tpu.memory_space<vmem>>, vector<1x1x96xf32>
    %10 = vector.shape_cast %9 : vector<1x1x96xf32> to vector<1x96xf32>
    %11 = arith.addf %3, %4 : vector<8x32xf32>
    %12 = arith.truncf %11 : vector<8x32xf32> to vector<8x32xbf16>
    %13 = arith.truncf %3 : vector<8x32xf32> to vector<8x32xbf16>
    %14 = vector.extract_strided_slice %8 {offsets = [0, 0], sizes = [32, 64], strides = [1, 1]} : vector<32x96xbf16> to vector<32x64xbf16>
    %15 = vector.extract_strided_slice %10 {offsets = [0, 0], sizes = [1, 64], strides = [1, 1]} : vector<1x96xf32> to vector<1x64xf32>
    %cst = arith.constant dense<0.000000e+00> : vector<8x64xf32>
    %16 = tpu.matmul %12, %14, %cst {dimension_numbers = #tpu.dot_dimension_numbers<[1], [0], [0], [1], [0, 0, 1, 1], [], []>} : vector<8x32xbf16>, vector<32x64xbf16>, vector<8x64xf32> -> vector<8x64xf32>
    %17 = vector.broadcast %15 : vector<1x64xf32> to vector<8x64xf32>
    %18 = arith.addf %16, %17 : vector<8x64xf32>
    %19 = vector.extract_strided_slice %8 {offsets = [0, 64], sizes = [32, 32], strides = [1, 1]} : vector<32x96xbf16> to vector<32x32xbf16>
    %20 = vector.extract_strided_slice %10 {offsets = [0, 64], sizes = [1, 32], strides = [1, 1]} : vector<1x96xf32> to vector<1x32xf32>
    %cst_13 = arith.constant dense<0.000000e+00> : vector<8x32xf32>
    %21 = tpu.matmul %13, %19, %cst_13 {dimension_numbers = #tpu.dot_dimension_numbers<[1], [0], [0], [1], [0, 0, 1, 1], [], []>} : vector<8x32xbf16>, vector<32x32xbf16>, vector<8x32xf32> -> vector<8x32xf32>
    %22 = vector.broadcast %20 : vector<1x32xf32> to vector<8x32xf32>
    %23 = arith.addf %21, %22 : vector<8x32xf32>
    %24 = vector.extract_strided_slice %18 {offsets = [0, 0], sizes = [8, 32], strides = [1, 1]} : vector<8x64xf32> to vector<8x32xf32>
    %25 = vector.extract_strided_slice %18 {offsets = [0, 32], sizes = [8, 32], strides = [1, 1]} : vector<8x64xf32> to vector<8x32xf32>
    %cst_14 = arith.constant 0.353553385 : f32
    %26 = vector.broadcast %cst_14 : f32 to vector<8x32xf32>
    %27 = arith.mulf %24, %26 : vector<8x32xf32>
    %28 = arith.truncf %27 : vector<8x32xf32> to vector<8x32xbf16>
    %29 = vector.shape_cast %28 : vector<8x32xbf16> to vector<1x8x32xbf16>
    %30 = arith.truncf %25 : vector<8x32xf32> to vector<8x32xbf16>
    %31 = vector.shape_cast %30 : vector<8x32xbf16> to vector<1x8x32xbf16>
    %32 = arith.truncf %23 : vector<8x32xf32> to vector<8x32xbf16>
    %33 = vector.shape_cast %32 : vector<8x32xbf16> to vector<1x8x32xbf16>
    %34 = vector.extract_strided_slice %29 {offsets = [0, 0, 0], sizes = [1, 8, 8], strides = [1, 1, 1]} : vector<1x8x32xbf16> to vector<1x8x8xbf16>
    %35 = vector.extract_strided_slice %31 {offsets = [0, 0, 0], sizes = [1, 8, 8], strides = [1, 1, 1]} : vector<1x8x32xbf16> to vector<1x8x8xbf16>
    "tpu.trace_start"() <{level = 10 : i32, message = "bqd,bkd->bqk"}> : () -> ()
    %cst_15 = arith.constant dense<0.000000e+00> : vector<1x8x8xf32>
    %36 = tpu.matmul %34, %35, %cst_15 {dimension_numbers = #tpu.dot_dimension_numbers<[2], [2], [1], [1], [0, 0, 0, 1, 1, 1], [0], [0]>} : vector<1x8x8xbf16>, vector<1x8x8xbf16>, vector<1x8x8xf32> -> vector<1x8x8xf32>
    "tpu.trace_stop"() : () -> ()
    %cst_16 = arith.constant dense<0xFF800000> : vector<1x8xf32>
    %37 = vector.multi_reduction <maximumf>, %36, %cst_16 [2] : vector<1x8x8xf32> to vector<1x8xf32>
    %38 = vector.shape_cast %37 : vector<1x8xf32> to vector<1x8x1xf32>
    %39 = vector.broadcast %38 : vector<1x8x1xf32> to vector<1x8x8xf32>
    %40 = arith.subf %36, %39 : vector<1x8x8xf32>
    %41 = math.exp %40 : vector<1x8x8xf32>
    %cst_17 = arith.constant dense<0.000000e+00> : vector<1x8xf32>
    %42 = vector.multi_reduction <add>, %41, %cst_17 [2] : vector<1x8x8xf32> to vector<1x8xf32>
    %43 = vector.shape_cast %42 : vector<1x8xf32> to vector<1x8x1xf32>
    %44 = tpu.reciprocal %43 {approx = true} : vector<1x8x1xf32> -> vector<1x8x1xf32>
    %45 = vector.broadcast %44 : vector<1x8x1xf32> to vector<1x8x8xf32>
    %46 = arith.mulf %41, %45 : vector<1x8x8xf32>
    %47 = arith.truncf %46 : vector<1x8x8xf32> to vector<1x8x8xbf16>
    %48 = vector.extract_strided_slice %33 {offsets = [0, 0, 0], sizes = [1, 8, 8], strides = [1, 1, 1]} : vector<1x8x32xbf16> to vector<1x8x8xbf16>
    "tpu.trace_start"() <{level = 10 : i32, message = "bqk,bkd->bqd"}> : () -> ()
    %cst_18 = arith.constant dense<0.000000e+00> : vector<1x8x8xf32>
    %49 = tpu.matmul %47, %48, %cst_18 {dimension_numbers = #tpu.dot_dimension_numbers<[2], [1], [1], [2], [0, 0, 0, 1, 1, 2], [0], [0]>} : vector<1x8x8xbf16>, vector<1x8x8xbf16>, vector<1x8x8xf32> -> vector<1x8x8xf32>
    "tpu.trace_stop"() : () -> ()
    %50 = vector.extract_strided_slice %29 {offsets = [0, 0, 8], sizes = [1, 8, 8], strides = [1, 1, 1]} : vector<1x8x32xbf16> to vector<1x8x8xbf16>
    %51 = vector.extract_strided_slice %31 {offsets = [0, 0, 8], sizes = [1, 8, 8], strides = [1, 1, 1]} : vector<1x8x32xbf16> to vector<1x8x8xbf16>
    "tpu.trace_start"() <{level = 10 : i32, message = "bqd,bkd->bqk"}> : () -> ()
    %cst_19 = arith.constant dense<0.000000e+00> : vector<1x8x8xf32>
    %52 = tpu.matmul %50, %51, %cst_19 {dimension_numbers = #tpu.dot_dimension_numbers<[2], [2], [1], [1], [0, 0, 0, 1, 1, 1], [0], [0]>} : vector<1x8x8xbf16>, vector<1x8x8xbf16>, vector<1x8x8xf32> -> vector<1x8x8xf32>
    "tpu.trace_stop"() : () -> ()
    %cst_20 = arith.constant dense<0xFF800000> : vector<1x8xf32>
    %53 = vector.multi_reduction <maximumf>, %52, %cst_20 [2] : vector<1x8x8xf32> to vector<1x8xf32>
    %54 = vector.shape_cast %53 : vector<1x8xf32> to vector<1x8x1xf32>
    %55 = vector.broadcast %54 : vector<1x8x1xf32> to vector<1x8x8xf32>
    %56 = arith.subf %52, %55 : vector<1x8x8xf32>
    %57 = math.exp %56 : vector<1x8x8xf32>
    %cst_21 = arith.constant dense<0.000000e+00> : vector<1x8xf32>
    %58 = vector.multi_reduction <add>, %57, %cst_21 [2] : vector<1x8x8xf32> to vector<1x8xf32>
    %59 = vector.shape_cast %58 : vector<1x8xf32> to vector<1x8x1xf32>
    %60 = tpu.reciprocal %59 {approx = true} : vector<1x8x1xf32> -> vector<1x8x1xf32>
    %61 = vector.broadcast %60 : vector<1x8x1xf32> to vector<1x8x8xf32>
    %62 = arith.mulf %57, %61 : vector<1x8x8xf32>
    %63 = arith.truncf %62 : vector<1x8x8xf32> to vector<1x8x8xbf16>
    %64 = vector.extract_strided_slice %33 {offsets = [0, 0, 8], sizes = [1, 8, 8], strides = [1, 1, 1]} : vector<1x8x32xbf16> to vector<1x8x8xbf16>
    "tpu.trace_start"() <{level = 10 : i32, message = "bqk,bkd->bqd"}> : () -> ()
    %cst_22 = arith.constant dense<0.000000e+00> : vector<1x8x8xf32>
    %65 = tpu.matmul %63, %64, %cst_22 {dimension_numbers = #tpu.dot_dimension_numbers<[2], [1], [1], [2], [0, 0, 0, 1, 1, 2], [0], [0]>} : vector<1x8x8xbf16>, vector<1x8x8xbf16>, vector<1x8x8xf32> -> vector<1x8x8xf32>
    "tpu.trace_stop"() : () -> ()
    %66 = vector.extract_strided_slice %29 {offsets = [0, 0, 16], sizes = [1, 8, 8], strides = [1, 1, 1]} : vector<1x8x32xbf16> to vector<1x8x8xbf16>
    %67 = vector.extract_strided_slice %31 {offsets = [0, 0, 16], sizes = [1, 8, 8], strides = [1, 1, 1]} : vector<1x8x32xbf16> to vector<1x8x8xbf16>
    "tpu.trace_start"() <{level = 10 : i32, message = "bqd,bkd->bqk"}> : () -> ()
    %cst_23 = arith.constant dense<0.000000e+00> : vector<1x8x8xf32>
    %68 = tpu.matmul %66, %67, %cst_23 {dimension_numbers = #tpu.dot_dimension_numbers<[2], [2], [1], [1], [0, 0, 0, 1, 1, 1], [0], [0]>} : vector<1x8x8xbf16>, vector<1x8x8xbf16>, vector<1x8x8xf32> -> vector<1x8x8xf32>
    "tpu.trace_stop"() : () -> ()
    %cst_24 = arith.constant dense<0xFF800000> : vector<1x8xf32>
    %69 = vector.multi_reduction <maximumf>, %68, %cst_24 [2] : vector<1x8x8xf32> to vector<1x8xf32>
    %70 = vector.shape_cast %69 : vector<1x8xf32> to vector<1x8x1xf32>
    %71 = vector.broadcast %70 : vector<1x8x1xf32> to vector<1x8x8xf32>
    %72 = arith.subf %68, %71 : vector<1x8x8xf32>
    %73 = math.exp %72 : vector<1x8x8xf32>
    %cst_25 = arith.constant dense<0.000000e+00> : vector<1x8xf32>
    %74 = vector.multi_reduction <add>, %73, %cst_25 [2] : vector<1x8x8xf32> to vector<1x8xf32>
    %75 = vector.shape_cast %74 : vector<1x8xf32> to vector<1x8x1xf32>
    %76 = tpu.reciprocal %75 {approx = true} : vector<1x8x1xf32> -> vector<1x8x1xf32>
    %77 = vector.broadcast %76 : vector<1x8x1xf32> to vector<1x8x8xf32>
    %78 = arith.mulf %73, %77 : vector<1x8x8xf32>
    %79 = arith.truncf %78 : vector<1x8x8xf32> to vector<1x8x8xbf16>
    %80 = vector.extract_strided_slice %33 {offsets = [0, 0, 16], sizes = [1, 8, 8], strides = [1, 1, 1]} : vector<1x8x32xbf16> to vector<1x8x8xbf16>
    "tpu.trace_start"() <{level = 10 : i32, message = "bqk,bkd->bqd"}> : () -> ()
    %cst_26 = arith.constant dense<0.000000e+00> : vector<1x8x8xf32>
    %81 = tpu.matmul %79, %80, %cst_26 {dimension_numbers = #tpu.dot_dimension_numbers<[2], [1], [1], [2], [0, 0, 0, 1, 1, 2], [0], [0]>} : vector<1x8x8xbf16>, vector<1x8x8xbf16>, vector<1x8x8xf32> -> vector<1x8x8xf32>
    "tpu.trace_stop"() : () -> ()
    %82 = vector.extract_strided_slice %29 {offsets = [0, 0, 24], sizes = [1, 8, 8], strides = [1, 1, 1]} : vector<1x8x32xbf16> to vector<1x8x8xbf16>
    %83 = vector.extract_strided_slice %31 {offsets = [0, 0, 24], sizes = [1, 8, 8], strides = [1, 1, 1]} : vector<1x8x32xbf16> to vector<1x8x8xbf16>
    "tpu.trace_start"() <{level = 10 : i32, message = "bqd,bkd->bqk"}> : () -> ()
    %cst_27 = arith.constant dense<0.000000e+00> : vector<1x8x8xf32>
    %84 = tpu.matmul %82, %83, %cst_27 {dimension_numbers = #tpu.dot_dimension_numbers<[2], [2], [1], [1], [0, 0, 0, 1, 1, 1], [0], [0]>} : vector<1x8x8xbf16>, vector<1x8x8xbf16>, vector<1x8x8xf32> -> vector<1x8x8xf32>
    "tpu.trace_stop"() : () -> ()
    %cst_28 = arith.constant dense<0xFF800000> : vector<1x8xf32>
    %85 = vector.multi_reduction <maximumf>, %84, %cst_28 [2] : vector<1x8x8xf32> to vector<1x8xf32>
    %86 = vector.shape_cast %85 : vector<1x8xf32> to vector<1x8x1xf32>
    %87 = vector.broadcast %86 : vector<1x8x1xf32> to vector<1x8x8xf32>
    %88 = arith.subf %84, %87 : vector<1x8x8xf32>
    %89 = math.exp %88 : vector<1x8x8xf32>
    %cst_29 = arith.constant dense<0.000000e+00> : vector<1x8xf32>
    %90 = vector.multi_reduction <add>, %89, %cst_29 [2] : vector<1x8x8xf32> to vector<1x8xf32>
    %91 = vector.shape_cast %90 : vector<1x8xf32> to vector<1x8x1xf32>
    %92 = tpu.reciprocal %91 {approx = true} : vector<1x8x1xf32> -> vector<1x8x1xf32>
    %93 = vector.broadcast %92 : vector<1x8x1xf32> to vector<1x8x8xf32>
    %94 = arith.mulf %89, %93 : vector<1x8x8xf32>
    %95 = arith.truncf %94 : vector<1x8x8xf32> to vector<1x8x8xbf16>
    %96 = vector.extract_strided_slice %33 {offsets = [0, 0, 24], sizes = [1, 8, 8], strides = [1, 1, 1]} : vector<1x8x32xbf16> to vector<1x8x8xbf16>
    "tpu.trace_start"() <{level = 10 : i32, message = "bqk,bkd->bqd"}> : () -> ()
    %cst_30 = arith.constant dense<0.000000e+00> : vector<1x8x8xf32>
    %97 = tpu.matmul %95, %96, %cst_30 {dimension_numbers = #tpu.dot_dimension_numbers<[2], [1], [1], [2], [0, 0, 0, 1, 1, 2], [0], [0]>} : vector<1x8x8xbf16>, vector<1x8x8xbf16>, vector<1x8x8xf32> -> vector<1x8x8xf32>
    "tpu.trace_stop"() : () -> ()
    %98 = tpu.concatenate %49, %65, %81, %97 in 2 : vector<1x8x8xf32>, vector<1x8x8xf32>, vector<1x8x8xf32>, vector<1x8x8xf32> -> vector<1x8x32xf32>
    %99 = vector.shape_cast %98 : vector<1x8x32xf32> to vector<8x32xf32>
    %100 = arith.truncf %99 : vector<8x32xf32> to vector<8x32xbf16>
    %c0_31 = arith.constant 0 : index
    %c0_32 = arith.constant 0 : index
    %c0_33 = arith.constant 0 : index
    %101 = vector.load %arg8[%c0_31, %c0_32, %c0_33] : memref<1x32x32xbf16, #tpu.memory_space<vmem>>, vector<1x32x32xbf16>
    %102 = vector.shape_cast %101 : vector<1x32x32xbf16> to vector<32x32xbf16>
    %c0_34 = arith.constant 0 : index
    %c0_35 = arith.constant 0 : index
    %c0_36 = arith.constant 0 : index
    %103 = vector.load %arg9[%c0_34, %c0_35, %c0_36] : memref<1x1x32xf32, #tpu.memory_space<vmem>>, vector<1x1x32xf32>
    %104 = vector.shape_cast %103 : vector<1x1x32xf32> to vector<1x32xf32>
    %cst_37 = arith.constant dense<0.000000e+00> : vector<8x32xf32>
    %105 = tpu.matmul %100, %102, %cst_37 {dimension_numbers = #tpu.dot_dimension_numbers<[1], [0], [0], [1], [0, 0, 1, 1], [], []>} : vector<8x32xbf16>, vector<32x32xbf16>, vector<8x32xf32> -> vector<8x32xf32>
    %106 = vector.broadcast %104 : vector<1x32xf32> to vector<8x32xf32>
    %107 = arith.addf %105, %106 : vector<8x32xf32>
    %108 = arith.addf %3, %107 : vector<8x32xf32>
    %109 = vector.extract_strided_slice %6 {offsets = [0, 0], sizes = [1, 32], strides = [1, 1]} : vector<6x32xf32> to vector<1x32xf32>
    %110 = vector.extract_strided_slice %6 {offsets = [1, 0], sizes = [1, 32], strides = [1, 1]} : vector<6x32xf32> to vector<1x32xf32>
    %cst_38 = arith.constant dense<0.000000e+00> : vector<8xf32>
    %111 = vector.multi_reduction <add>, %108, %cst_38 [1] : vector<8x32xf32> to vector<8xf32>
    %112 = vector.shape_cast %111 : vector<8xf32> to vector<8x1xf32>
    %cst_39 = arith.constant 3.200000e+01 : f32
    %113 = vector.broadcast %cst_39 : f32 to vector<8x1xf32>
    %114 = arith.divf %112, %113 : vector<8x1xf32>
    %115 = vector.broadcast %114 : vector<8x1xf32> to vector<8x32xf32>
    %116 = arith.subf %108, %115 : vector<8x32xf32>
    %117 = arith.mulf %116, %116 : vector<8x32xf32>
    %cst_40 = arith.constant dense<0.000000e+00> : vector<8xf32>
    %118 = vector.multi_reduction <add>, %117, %cst_40 [1] : vector<8x32xf32> to vector<8xf32>
    %119 = vector.shape_cast %118 : vector<8xf32> to vector<8x1xf32>
    %cst_41 = arith.constant 3.200000e+01 : f32
    %120 = vector.broadcast %cst_41 : f32 to vector<8x1xf32>
    %121 = arith.divf %119, %120 : vector<8x1xf32>
    %cst_42 = arith.constant 9.99999974E-6 : f32
    %122 = vector.broadcast %cst_42 : f32 to vector<8x1xf32>
    %123 = arith.addf %121, %122 : vector<8x1xf32>
    %124 = math.rsqrt %123 : vector<8x1xf32>
    %125 = vector.broadcast %124 : vector<8x1xf32> to vector<8x32xf32>
    %126 = arith.mulf %116, %125 : vector<8x32xf32>
    %127 = vector.broadcast %109 : vector<1x32xf32> to vector<8x32xf32>
    %128 = arith.mulf %126, %127 : vector<8x32xf32>
    %129 = vector.broadcast %110 : vector<1x32xf32> to vector<8x32xf32>
    %130 = arith.addf %128, %129 : vector<8x32xf32>
    %c0_43 = arith.constant 0 : index
    %c0_44 = arith.constant 0 : index
    %c0_45 = arith.constant 0 : index
    %131 = vector.load %arg10[%c0_43, %c0_44, %c0_45] : memref<1x32x96xbf16, #tpu.memory_space<vmem>>, vector<1x32x96xbf16>
    %132 = vector.shape_cast %131 : vector<1x32x96xbf16> to vector<32x96xbf16>
    %c0_46 = arith.constant 0 : index
    %c0_47 = arith.constant 0 : index
    %c0_48 = arith.constant 0 : index
    %133 = vector.load %arg11[%c0_46, %c0_47, %c0_48] : memref<1x1x96xf32, #tpu.memory_space<vmem>>, vector<1x1x96xf32>
    %134 = vector.shape_cast %133 : vector<1x1x96xf32> to vector<1x96xf32>
    %135 = arith.addf %130, %4 : vector<8x32xf32>
    %136 = arith.truncf %135 : vector<8x32xf32> to vector<8x32xbf16>
    %137 = vector.extract_strided_slice %132 {offsets = [0, 0], sizes = [32, 32], strides = [1, 1]} : vector<32x96xbf16> to vector<32x32xbf16>
    %138 = vector.extract_strided_slice %134 {offsets = [0, 0], sizes = [1, 32], strides = [1, 1]} : vector<1x96xf32> to vector<1x32xf32>
    %cst_49 = arith.constant dense<0.000000e+00> : vector<8x32xf32>
    %139 = tpu.matmul %136, %137, %cst_49 {dimension_numbers = #tpu.dot_dimension_numbers<[1], [0], [0], [1], [0, 0, 1, 1], [], []>} : vector<8x32xbf16>, vector<32x32xbf16>, vector<8x32xf32> -> vector<8x32xf32>
    %140 = vector.broadcast %138 : vector<1x32xf32> to vector<8x32xf32>
    %141 = arith.addf %139, %140 : vector<8x32xf32>
    %c0_50 = arith.constant 0 : index
    %c0_51 = arith.constant 0 : index
    %142 = vector.load %arg5[%c0_50, %c0_51] : memref<16x32xbf16, #tpu.memory_space<vmem>>, vector<16x32xbf16>
    %143 = vector.extract_strided_slice %132 {offsets = [0, 32], sizes = [32, 32], strides = [1, 1]} : vector<32x96xbf16> to vector<32x32xbf16>
    %144 = vector.extract_strided_slice %134 {offsets = [0, 32], sizes = [1, 32], strides = [1, 1]} : vector<1x96xf32> to vector<1x32xf32>
    %cst_52 = arith.constant dense<0.000000e+00> : vector<16x32xf32>
    %145 = tpu.matmul %142, %143, %cst_52 {dimension_numbers = #tpu.dot_dimension_numbers<[1], [0], [0], [1], [0, 0, 1, 1], [], []>} : vector<16x32xbf16>, vector<32x32xbf16>, vector<16x32xf32> -> vector<16x32xf32>
    %146 = vector.broadcast %144 : vector<1x32xf32> to vector<16x32xf32>
    %147 = arith.addf %145, %146 : vector<16x32xf32>
    %c0_53 = arith.constant 0 : index
    %c0_54 = arith.constant 0 : index
    %148 = vector.load %arg4[%c0_53, %c0_54] : memref<16x32xbf16, #tpu.memory_space<vmem>>, vector<16x32xbf16>
    %149 = vector.extract_strided_slice %132 {offsets = [0, 64], sizes = [32, 32], strides = [1, 1]} : vector<32x96xbf16> to vector<32x32xbf16>
    %150 = vector.extract_strided_slice %134 {offsets = [0, 64], sizes = [1, 32], strides = [1, 1]} : vector<1x96xf32> to vector<1x32xf32>
    %cst_55 = arith.constant dense<0.000000e+00> : vector<16x32xf32>
    %151 = tpu.matmul %148, %149, %cst_55 {dimension_numbers = #tpu.dot_dimension_numbers<[1], [0], [0], [1], [0, 0, 1, 1], [], []>} : vector<16x32xbf16>, vector<32x32xbf16>, vector<16x32xf32> -> vector<16x32xf32>
    %152 = vector.broadcast %150 : vector<1x32xf32> to vector<16x32xf32>
    %153 = arith.addf %151, %152 : vector<16x32xf32>
    %cst_56 = arith.constant 0.353553385 : f32
    %154 = vector.broadcast %cst_56 : f32 to vector<8x32xf32>
    %155 = arith.mulf %141, %154 : vector<8x32xf32>
    %156 = arith.truncf %155 : vector<8x32xf32> to vector<8x32xbf16>
    %157 = vector.shape_cast %156 : vector<8x32xbf16> to vector<1x8x32xbf16>
    %158 = arith.truncf %147 : vector<16x32xf32> to vector<16x32xbf16>
    %159 = vector.shape_cast %158 : vector<16x32xbf16> to vector<1x16x32xbf16>
    %160 = arith.truncf %153 : vector<16x32xf32> to vector<16x32xbf16>
    %161 = vector.shape_cast %160 : vector<16x32xbf16> to vector<1x16x32xbf16>
    %162 = vector.extract_strided_slice %157 {offsets = [0, 0, 0], sizes = [1, 8, 8], strides = [1, 1, 1]} : vector<1x8x32xbf16> to vector<1x8x8xbf16>
    %163 = vector.extract_strided_slice %159 {offsets = [0, 0, 0], sizes = [1, 16, 8], strides = [1, 1, 1]} : vector<1x16x32xbf16> to vector<1x16x8xbf16>
    "tpu.trace_start"() <{level = 10 : i32, message = "bqd,bkd->bqk"}> : () -> ()
    %cst_57 = arith.constant dense<0.000000e+00> : vector<1x8x16xf32>
    %164 = tpu.matmul %162, %163, %cst_57 {dimension_numbers = #tpu.dot_dimension_numbers<[2], [2], [1], [1], [0, 0, 0, 1, 1, 1], [0], [0]>} : vector<1x8x8xbf16>, vector<1x16x8xbf16>, vector<1x8x16xf32> -> vector<1x8x16xf32>
    "tpu.trace_stop"() : () -> ()
    %cst_58 = arith.constant dense<0xFF800000> : vector<1x8xf32>
    %165 = vector.multi_reduction <maximumf>, %164, %cst_58 [2] : vector<1x8x16xf32> to vector<1x8xf32>
    %166 = vector.shape_cast %165 : vector<1x8xf32> to vector<1x8x1xf32>
    %167 = vector.broadcast %166 : vector<1x8x1xf32> to vector<1x8x16xf32>
    %168 = arith.subf %164, %167 : vector<1x8x16xf32>
    %169 = math.exp %168 : vector<1x8x16xf32>
    %cst_59 = arith.constant dense<0.000000e+00> : vector<1x8xf32>
    %170 = vector.multi_reduction <add>, %169, %cst_59 [2] : vector<1x8x16xf32> to vector<1x8xf32>
    %171 = vector.shape_cast %170 : vector<1x8xf32> to vector<1x8x1xf32>
    %172 = tpu.reciprocal %171 {approx = true} : vector<1x8x1xf32> -> vector<1x8x1xf32>
    %173 = vector.broadcast %172 : vector<1x8x1xf32> to vector<1x8x16xf32>
    %174 = arith.mulf %169, %173 : vector<1x8x16xf32>
    %175 = arith.truncf %174 : vector<1x8x16xf32> to vector<1x8x16xbf16>
    %176 = vector.extract_strided_slice %161 {offsets = [0, 0, 0], sizes = [1, 16, 8], strides = [1, 1, 1]} : vector<1x16x32xbf16> to vector<1x16x8xbf16>
    "tpu.trace_start"() <{level = 10 : i32, message = "bqk,bkd->bqd"}> : () -> ()
    %cst_60 = arith.constant dense<0.000000e+00> : vector<1x8x8xf32>
    %177 = tpu.matmul %175, %176, %cst_60 {dimension_numbers = #tpu.dot_dimension_numbers<[2], [1], [1], [2], [0, 0, 0, 1, 1, 2], [0], [0]>} : vector<1x8x16xbf16>, vector<1x16x8xbf16>, vector<1x8x8xf32> -> vector<1x8x8xf32>
    "tpu.trace_stop"() : () -> ()
    %178 = vector.extract_strided_slice %157 {offsets = [0, 0, 8], sizes = [1, 8, 8], strides = [1, 1, 1]} : vector<1x8x32xbf16> to vector<1x8x8xbf16>
    %179 = vector.extract_strided_slice %159 {offsets = [0, 0, 8], sizes = [1, 16, 8], strides = [1, 1, 1]} : vector<1x16x32xbf16> to vector<1x16x8xbf16>
    "tpu.trace_start"() <{level = 10 : i32, message = "bqd,bkd->bqk"}> : () -> ()
    %cst_61 = arith.constant dense<0.000000e+00> : vector<1x8x16xf32>
    %180 = tpu.matmul %178, %179, %cst_61 {dimension_numbers = #tpu.dot_dimension_numbers<[2], [2], [1], [1], [0, 0, 0, 1, 1, 1], [0], [0]>} : vector<1x8x8xbf16>, vector<1x16x8xbf16>, vector<1x8x16xf32> -> vector<1x8x16xf32>
    "tpu.trace_stop"() : () -> ()
    %cst_62 = arith.constant dense<0xFF800000> : vector<1x8xf32>
    %181 = vector.multi_reduction <maximumf>, %180, %cst_62 [2] : vector<1x8x16xf32> to vector<1x8xf32>
    %182 = vector.shape_cast %181 : vector<1x8xf32> to vector<1x8x1xf32>
    %183 = vector.broadcast %182 : vector<1x8x1xf32> to vector<1x8x16xf32>
    %184 = arith.subf %180, %183 : vector<1x8x16xf32>
    %185 = math.exp %184 : vector<1x8x16xf32>
    %cst_63 = arith.constant dense<0.000000e+00> : vector<1x8xf32>
    %186 = vector.multi_reduction <add>, %185, %cst_63 [2] : vector<1x8x16xf32> to vector<1x8xf32>
    %187 = vector.shape_cast %186 : vector<1x8xf32> to vector<1x8x1xf32>
    %188 = tpu.reciprocal %187 {approx = true} : vector<1x8x1xf32> -> vector<1x8x1xf32>
    %189 = vector.broadcast %188 : vector<1x8x1xf32> to vector<1x8x16xf32>
    %190 = arith.mulf %185, %189 : vector<1x8x16xf32>
    %191 = arith.truncf %190 : vector<1x8x16xf32> to vector<1x8x16xbf16>
    %192 = vector.extract_strided_slice %161 {offsets = [0, 0, 8], sizes = [1, 16, 8], strides = [1, 1, 1]} : vector<1x16x32xbf16> to vector<1x16x8xbf16>
    "tpu.trace_start"() <{level = 10 : i32, message = "bqk,bkd->bqd"}> : () -> ()
    %cst_64 = arith.constant dense<0.000000e+00> : vector<1x8x8xf32>
    %193 = tpu.matmul %191, %192, %cst_64 {dimension_numbers = #tpu.dot_dimension_numbers<[2], [1], [1], [2], [0, 0, 0, 1, 1, 2], [0], [0]>} : vector<1x8x16xbf16>, vector<1x16x8xbf16>, vector<1x8x8xf32> -> vector<1x8x8xf32>
    "tpu.trace_stop"() : () -> ()
    %194 = vector.extract_strided_slice %157 {offsets = [0, 0, 16], sizes = [1, 8, 8], strides = [1, 1, 1]} : vector<1x8x32xbf16> to vector<1x8x8xbf16>
    %195 = vector.extract_strided_slice %159 {offsets = [0, 0, 16], sizes = [1, 16, 8], strides = [1, 1, 1]} : vector<1x16x32xbf16> to vector<1x16x8xbf16>
    "tpu.trace_start"() <{level = 10 : i32, message = "bqd,bkd->bqk"}> : () -> ()
    %cst_65 = arith.constant dense<0.000000e+00> : vector<1x8x16xf32>
    %196 = tpu.matmul %194, %195, %cst_65 {dimension_numbers = #tpu.dot_dimension_numbers<[2], [2], [1], [1], [0, 0, 0, 1, 1, 1], [0], [0]>} : vector<1x8x8xbf16>, vector<1x16x8xbf16>, vector<1x8x16xf32> -> vector<1x8x16xf32>
    "tpu.trace_stop"() : () -> ()
    %cst_66 = arith.constant dense<0xFF800000> : vector<1x8xf32>
    %197 = vector.multi_reduction <maximumf>, %196, %cst_66 [2] : vector<1x8x16xf32> to vector<1x8xf32>
    %198 = vector.shape_cast %197 : vector<1x8xf32> to vector<1x8x1xf32>
    %199 = vector.broadcast %198 : vector<1x8x1xf32> to vector<1x8x16xf32>
    %200 = arith.subf %196, %199 : vector<1x8x16xf32>
    %201 = math.exp %200 : vector<1x8x16xf32>
    %cst_67 = arith.constant dense<0.000000e+00> : vector<1x8xf32>
    %202 = vector.multi_reduction <add>, %201, %cst_67 [2] : vector<1x8x16xf32> to vector<1x8xf32>
    %203 = vector.shape_cast %202 : vector<1x8xf32> to vector<1x8x1xf32>
    %204 = tpu.reciprocal %203 {approx = true} : vector<1x8x1xf32> -> vector<1x8x1xf32>
    %205 = vector.broadcast %204 : vector<1x8x1xf32> to vector<1x8x16xf32>
    %206 = arith.mulf %201, %205 : vector<1x8x16xf32>
    %207 = arith.truncf %206 : vector<1x8x16xf32> to vector<1x8x16xbf16>
    %208 = vector.extract_strided_slice %161 {offsets = [0, 0, 16], sizes = [1, 16, 8], strides = [1, 1, 1]} : vector<1x16x32xbf16> to vector<1x16x8xbf16>
    "tpu.trace_start"() <{level = 10 : i32, message = "bqk,bkd->bqd"}> : () -> ()
    %cst_68 = arith.constant dense<0.000000e+00> : vector<1x8x8xf32>
    %209 = tpu.matmul %207, %208, %cst_68 {dimension_numbers = #tpu.dot_dimension_numbers<[2], [1], [1], [2], [0, 0, 0, 1, 1, 2], [0], [0]>} : vector<1x8x16xbf16>, vector<1x16x8xbf16>, vector<1x8x8xf32> -> vector<1x8x8xf32>
    "tpu.trace_stop"() : () -> ()
    %210 = vector.extract_strided_slice %157 {offsets = [0, 0, 24], sizes = [1, 8, 8], strides = [1, 1, 1]} : vector<1x8x32xbf16> to vector<1x8x8xbf16>
    %211 = vector.extract_strided_slice %159 {offsets = [0, 0, 24], sizes = [1, 16, 8], strides = [1, 1, 1]} : vector<1x16x32xbf16> to vector<1x16x8xbf16>
    "tpu.trace_start"() <{level = 10 : i32, message = "bqd,bkd->bqk"}> : () -> ()
    %cst_69 = arith.constant dense<0.000000e+00> : vector<1x8x16xf32>
    %212 = tpu.matmul %210, %211, %cst_69 {dimension_numbers = #tpu.dot_dimension_numbers<[2], [2], [1], [1], [0, 0, 0, 1, 1, 1], [0], [0]>} : vector<1x8x8xbf16>, vector<1x16x8xbf16>, vector<1x8x16xf32> -> vector<1x8x16xf32>
    "tpu.trace_stop"() : () -> ()
    %cst_70 = arith.constant dense<0xFF800000> : vector<1x8xf32>
    %213 = vector.multi_reduction <maximumf>, %212, %cst_70 [2] : vector<1x8x16xf32> to vector<1x8xf32>
    %214 = vector.shape_cast %213 : vector<1x8xf32> to vector<1x8x1xf32>
    %215 = vector.broadcast %214 : vector<1x8x1xf32> to vector<1x8x16xf32>
    %216 = arith.subf %212, %215 : vector<1x8x16xf32>
    %217 = math.exp %216 : vector<1x8x16xf32>
    %cst_71 = arith.constant dense<0.000000e+00> : vector<1x8xf32>
    %218 = vector.multi_reduction <add>, %217, %cst_71 [2] : vector<1x8x16xf32> to vector<1x8xf32>
    %219 = vector.shape_cast %218 : vector<1x8xf32> to vector<1x8x1xf32>
    %220 = tpu.reciprocal %219 {approx = true} : vector<1x8x1xf32> -> vector<1x8x1xf32>
    %221 = vector.broadcast %220 : vector<1x8x1xf32> to vector<1x8x16xf32>
    %222 = arith.mulf %217, %221 : vector<1x8x16xf32>
    %223 = arith.truncf %222 : vector<1x8x16xf32> to vector<1x8x16xbf16>
    %224 = vector.extract_strided_slice %161 {offsets = [0, 0, 24], sizes = [1, 16, 8], strides = [1, 1, 1]} : vector<1x16x32xbf16> to vector<1x16x8xbf16>
    "tpu.trace_start"() <{level = 10 : i32, message = "bqk,bkd->bqd"}> : () -> ()
    %cst_72 = arith.constant dense<0.000000e+00> : vector<1x8x8xf32>
    %225 = tpu.matmul %223, %224, %cst_72 {dimension_numbers = #tpu.dot_dimension_numbers<[2], [1], [1], [2], [0, 0, 0, 1, 1, 2], [0], [0]>} : vector<1x8x16xbf16>, vector<1x16x8xbf16>, vector<1x8x8xf32> -> vector<1x8x8xf32>
    "tpu.trace_stop"() : () -> ()
    %226 = tpu.concatenate %177, %193, %209, %225 in 2 : vector<1x8x8xf32>, vector<1x8x8xf32>, vector<1x8x8xf32>, vector<1x8x8xf32> -> vector<1x8x32xf32>
    %227 = vector.shape_cast %226 : vector<1x8x32xf32> to vector<8x32xf32>
    %228 = arith.truncf %227 : vector<8x32xf32> to vector<8x32xbf16>
    %c0_73 = arith.constant 0 : index
    %c0_74 = arith.constant 0 : index
    %c0_75 = arith.constant 0 : index
    %229 = vector.load %arg12[%c0_73, %c0_74, %c0_75] : memref<1x32x32xbf16, #tpu.memory_space<vmem>>, vector<1x32x32xbf16>
    %230 = vector.shape_cast %229 : vector<1x32x32xbf16> to vector<32x32xbf16>
    %c0_76 = arith.constant 0 : index
    %c0_77 = arith.constant 0 : index
    %c0_78 = arith.constant 0 : index
    %231 = vector.load %arg13[%c0_76, %c0_77, %c0_78] : memref<1x1x32xf32, #tpu.memory_space<vmem>>, vector<1x1x32xf32>
    %232 = vector.shape_cast %231 : vector<1x1x32xf32> to vector<1x32xf32>
    %cst_79 = arith.constant dense<0.000000e+00> : vector<8x32xf32>
    %233 = tpu.matmul %228, %230, %cst_79 {dimension_numbers = #tpu.dot_dimension_numbers<[1], [0], [0], [1], [0, 0, 1, 1], [], []>} : vector<8x32xbf16>, vector<32x32xbf16>, vector<8x32xf32> -> vector<8x32xf32>
    %234 = vector.broadcast %232 : vector<1x32xf32> to vector<8x32xf32>
    %235 = arith.addf %233, %234 : vector<8x32xf32>
    %236 = arith.addf %130, %235 : vector<8x32xf32>
    %237 = vector.extract_strided_slice %6 {offsets = [2, 0], sizes = [1, 32], strides = [1, 1]} : vector<6x32xf32> to vector<1x32xf32>
    %238 = vector.extract_strided_slice %6 {offsets = [3, 0], sizes = [1, 32], strides = [1, 1]} : vector<6x32xf32> to vector<1x32xf32>
    %cst_80 = arith.constant dense<0.000000e+00> : vector<8xf32>
    %239 = vector.multi_reduction <add>, %236, %cst_80 [1] : vector<8x32xf32> to vector<8xf32>
    %240 = vector.shape_cast %239 : vector<8xf32> to vector<8x1xf32>
    %cst_81 = arith.constant 3.200000e+01 : f32
    %241 = vector.broadcast %cst_81 : f32 to vector<8x1xf32>
    %242 = arith.divf %240, %241 : vector<8x1xf32>
    %243 = vector.broadcast %242 : vector<8x1xf32> to vector<8x32xf32>
    %244 = arith.subf %236, %243 : vector<8x32xf32>
    %245 = arith.mulf %244, %244 : vector<8x32xf32>
    %cst_82 = arith.constant dense<0.000000e+00> : vector<8xf32>
    %246 = vector.multi_reduction <add>, %245, %cst_82 [1] : vector<8x32xf32> to vector<8xf32>
    %247 = vector.shape_cast %246 : vector<8xf32> to vector<8x1xf32>
    %cst_83 = arith.constant 3.200000e+01 : f32
    %248 = vector.broadcast %cst_83 : f32 to vector<8x1xf32>
    %249 = arith.divf %247, %248 : vector<8x1xf32>
    %cst_84 = arith.constant 9.99999974E-6 : f32
    %250 = vector.broadcast %cst_84 : f32 to vector<8x1xf32>
    %251 = arith.addf %249, %250 : vector<8x1xf32>
    %252 = math.rsqrt %251 : vector<8x1xf32>
    %253 = vector.broadcast %252 : vector<8x1xf32> to vector<8x32xf32>
    %254 = arith.mulf %244, %253 : vector<8x32xf32>
    %255 = vector.broadcast %237 : vector<1x32xf32> to vector<8x32xf32>
    %256 = arith.mulf %254, %255 : vector<8x32xf32>
    %257 = vector.broadcast %238 : vector<1x32xf32> to vector<8x32xf32>
    %258 = arith.addf %256, %257 : vector<8x32xf32>
    %259 = arith.truncf %258 : vector<8x32xf32> to vector<8x32xbf16>
    %c0_85 = arith.constant 0 : index
    %c0_86 = arith.constant 0 : index
    %c0_87 = arith.constant 0 : index
    %260 = vector.load %arg14[%c0_85, %c0_86, %c0_87] : memref<1x32x64xbf16, #tpu.memory_space<vmem>>, vector<1x32x64xbf16>
    %261 = vector.shape_cast %260 : vector<1x32x64xbf16> to vector<32x64xbf16>
    %c0_88 = arith.constant 0 : index
    %c0_89 = arith.constant 0 : index
    %c0_90 = arith.constant 0 : index
    %262 = vector.load %arg15[%c0_88, %c0_89, %c0_90] : memref<1x1x64xf32, #tpu.memory_space<vmem>>, vector<1x1x64xf32>
    %263 = vector.shape_cast %262 : vector<1x1x64xf32> to vector<1x64xf32>
    %cst_91 = arith.constant dense<0.000000e+00> : vector<8x64xf32>
    %264 = tpu.matmul %259, %261, %cst_91 {dimension_numbers = #tpu.dot_dimension_numbers<[1], [0], [0], [1], [0, 0, 1, 1], [], []>} : vector<8x32xbf16>, vector<32x64xbf16>, vector<8x64xf32> -> vector<8x64xf32>
    %265 = vector.broadcast %263 : vector<1x64xf32> to vector<8x64xf32>
    %266 = arith.addf %264, %265 : vector<8x64xf32>
    %cst_92 = arith.constant 0.000000e+00 : f32
    %267 = vector.broadcast %cst_92 : f32 to vector<8x64xf32>
    %268 = arith.maximumf %266, %267 : vector<8x64xf32>
    %269 = arith.truncf %268 : vector<8x64xf32> to vector<8x64xbf16>
    %c0_93 = arith.constant 0 : index
    %c0_94 = arith.constant 0 : index
    %c0_95 = arith.constant 0 : index
    %270 = vector.load %arg16[%c0_93, %c0_94, %c0_95] : memref<1x64x32xbf16, #tpu.memory_space<vmem>>, vector<1x64x32xbf16>
    %271 = vector.shape_cast %270 : vector<1x64x32xbf16> to vector<64x32xbf16>
    %c0_96 = arith.constant 0 : index
    %c0_97 = arith.constant 0 : index
    %c0_98 = arith.constant 0 : index
    %272 = vector.load %arg17[%c0_96, %c0_97, %c0_98] : memref<1x1x32xf32, #tpu.memory_space<vmem>>, vector<1x1x32xf32>
    %273 = vector.shape_cast %272 : vector<1x1x32xf32> to vector<1x32xf32>
    %cst_99 = arith.constant dense<0.000000e+00> : vector<8x32xf32>
    %274 = tpu.matmul %269, %271, %cst_99 {dimension_numbers = #tpu.dot_dimension_numbers<[1], [0], [0], [1], [0, 0, 1, 1], [], []>} : vector<8x64xbf16>, vector<64x32xbf16>, vector<8x32xf32> -> vector<8x32xf32>
    %275 = vector.broadcast %273 : vector<1x32xf32> to vector<8x32xf32>
    %276 = arith.addf %274, %275 : vector<8x32xf32>
    %277 = arith.addf %258, %276 : vector<8x32xf32>
    %278 = vector.extract_strided_slice %6 {offsets = [4, 0], sizes = [1, 32], strides = [1, 1]} : vector<6x32xf32> to vector<1x32xf32>
    %279 = vector.extract_strided_slice %6 {offsets = [5, 0], sizes = [1, 32], strides = [1, 1]} : vector<6x32xf32> to vector<1x32xf32>
    %cst_100 = arith.constant dense<0.000000e+00> : vector<8xf32>
    %280 = vector.multi_reduction <add>, %277, %cst_100 [1] : vector<8x32xf32> to vector<8xf32>
    %281 = vector.shape_cast %280 : vector<8xf32> to vector<8x1xf32>
    %cst_101 = arith.constant 3.200000e+01 : f32
    %282 = vector.broadcast %cst_101 : f32 to vector<8x1xf32>
    %283 = arith.divf %281, %282 : vector<8x1xf32>
    %284 = vector.broadcast %283 : vector<8x1xf32> to vector<8x32xf32>
    %285 = arith.subf %277, %284 : vector<8x32xf32>
    %286 = arith.mulf %285, %285 : vector<8x32xf32>
    %cst_102 = arith.constant dense<0.000000e+00> : vector<8xf32>
    %287 = vector.multi_reduction <add>, %286, %cst_102 [1] : vector<8x32xf32> to vector<8xf32>
    %288 = vector.shape_cast %287 : vector<8xf32> to vector<8x1xf32>
    %cst_103 = arith.constant 3.200000e+01 : f32
    %289 = vector.broadcast %cst_103 : f32 to vector<8x1xf32>
    %290 = arith.divf %288, %289 : vector<8x1xf32>
    %cst_104 = arith.constant 9.99999974E-6 : f32
    %291 = vector.broadcast %cst_104 : f32 to vector<8x1xf32>
    %292 = arith.addf %290, %291 : vector<8x1xf32>
    %293 = math.rsqrt %292 : vector<8x1xf32>
    %294 = vector.broadcast %293 : vector<8x1xf32> to vector<8x32xf32>
    %295 = arith.mulf %285, %294 : vector<8x32xf32>
    %296 = vector.broadcast %278 : vector<1x32xf32> to vector<8x32xf32>
    %297 = arith.mulf %295, %296 : vector<8x32xf32>
    %298 = vector.broadcast %279 : vector<1x32xf32> to vector<8x32xf32>
    %299 = arith.addf %297, %298 : vector<8x32xf32>
    %c0_105 = arith.constant 0 : index
    %c0_106 = arith.constant 0 : index
    %300 = vector.load %arg21[%c0_105, %c0_106] : memref<8x32xf32, #tpu.memory_space<vmem>>, vector<8x32xf32>
    tpu.vector_store %arg21[%c0_105, %c0_106], %299 {strides = array<i32>} : memref<8x32xf32, #tpu.memory_space<vmem>>, vector<8x32xf32>,
    %c1_i32 = arith.constant 1 : i32
    %301 = arith.cmpi eq, %arg1, %c1_i32 : i32
    %302 = arith.extui %301 : i1 to i32
    %c0_i32_107 = arith.constant 0 : i32
    %303 = arith.cmpi ne, %302, %c0_i32_107 : i32
    scf.if %303 {
      %c0_108 = arith.constant 0 : index
      %c0_109 = arith.constant 0 : index
      %304 = vector.load %arg19[%c0_108, %c0_109] : memref<2x32xf32, #tpu.memory_space<vmem>>, vector<2x32xf32>
      %305 = vector.extract_strided_slice %304 {offsets = [0, 0], sizes = [1, 32], strides = [1, 1]} : vector<2x32xf32> to vector<1x32xf32>
      %306 = vector.extract_strided_slice %304 {offsets = [1, 0], sizes = [1, 32], strides = [1, 1]} : vector<2x32xf32> to vector<1x32xf32>
      %cst_110 = arith.constant dense<0.000000e+00> : vector<8xf32>
      %307 = vector.multi_reduction <add>, %299, %cst_110 [1] : vector<8x32xf32> to vector<8xf32>
      %308 = vector.shape_cast %307 : vector<8xf32> to vector<8x1xf32>
      %cst_111 = arith.constant 3.200000e+01 : f32
      %309 = vector.broadcast %cst_111 : f32 to vector<8x1xf32>
      %310 = arith.divf %308, %309 : vector<8x1xf32>
      %311 = vector.broadcast %310 : vector<8x1xf32> to vector<8x32xf32>
      %312 = arith.subf %299, %311 : vector<8x32xf32>
      %313 = arith.mulf %312, %312 : vector<8x32xf32>
      %cst_112 = arith.constant dense<0.000000e+00> : vector<8xf32>
      %314 = vector.multi_reduction <add>, %313, %cst_112 [1] : vector<8x32xf32> to vector<8xf32>
      %315 = vector.shape_cast %314 : vector<8xf32> to vector<8x1xf32>
      %cst_113 = arith.constant 3.200000e+01 : f32
      %316 = vector.broadcast %cst_113 : f32 to vector<8x1xf32>
      %317 = arith.divf %315, %316 : vector<8x1xf32>
      %cst_114 = arith.constant 9.99999974E-6 : f32
      %318 = vector.broadcast %cst_114 : f32 to vector<8x1xf32>
      %319 = arith.addf %317, %318 : vector<8x1xf32>
      %320 = math.rsqrt %319 : vector<8x1xf32>
      %321 = vector.broadcast %320 : vector<8x1xf32> to vector<8x32xf32>
      %322 = arith.mulf %312, %321 : vector<8x32xf32>
      %323 = vector.broadcast %305 : vector<1x32xf32> to vector<8x32xf32>
      %324 = arith.mulf %322, %323 : vector<8x32xf32>
      %325 = vector.broadcast %306 : vector<1x32xf32> to vector<8x32xf32>
      %326 = arith.addf %324, %325 : vector<8x32xf32>
      %c0_115 = arith.constant 0 : index
      %c0_116 = arith.constant 0 : index
      %327 = vector.load %arg20[%c0_115, %c0_116] : memref<8x32xf32, #tpu.memory_space<vmem>>, vector<8x32xf32>
      tpu.vector_store %arg20[%c0_115, %c0_116], %326 {strides = array<i32>} : memref<8x32xf32, #tpu.memory_space<vmem>>, vector<8x32xf32>,
    } else {
    }
    return
  }
  func.func @transform_0(%arg0: i32, %arg1: i32) -> (i32, i32) {
    %c0_i32 = arith.constant 0 : i32
    %c0_i32_0 = arith.constant 0 : i32
    return %arg0, %c0_i32 : i32, i32
  }
  func.func @transform_1(%arg0: i32, %arg1: i32) -> (i32, i32) {
    %c0_i32 = arith.constant 0 : i32
    %c0_i32_0 = arith.constant 0 : i32
    return %arg0, %c0_i32 : i32, i32
  }
  func.func @transform_2(%arg0: i32, %arg1: i32) -> (i32, i32) {
    %c0_i32 = arith.constant 0 : i32
    %c0_i32_0 = arith.constant 0 : i32
    return %arg0, %c0_i32 : i32, i32
  }
  func.func @transform_3(%arg0: i32, %arg1: i32) -> (i32, i32) {
    %c0_i32 = arith.constant 0 : i32
    %c0_i32_0 = arith.constant 0 : i32
    return %arg0, %c0_i32 : i32, i32
  }
  func.func @transform_4(%arg0: i32, %arg1: i32) -> (i32, i32, i32) {
    %c0_i32 = arith.constant 0 : i32
    %c0_i32_0 = arith.constant 0 : i32
    %c0_i32_1 = arith.constant 0 : i32
    return %arg1, %c0_i32, %c0_i32_0 : i32, i32, i32
  }
  func.func @transform_5(%arg0: i32, %arg1: i32) -> (i32, i32, i32) {
    %c0_i32 = arith.constant 0 : i32
    %c0_i32_0 = arith.constant 0 : i32
    %c0_i32_1 = arith.constant 0 : i32
    return %arg1, %c0_i32, %c0_i32_0 : i32, i32, i32
  }
  func.func @transform_6(%arg0: i32, %arg1: i32) -> (i32, i32, i32) {
    %c0_i32 = arith.constant 0 : i32
    %c0_i32_0 = arith.constant 0 : i32
    %c0_i32_1 = arith.constant 0 : i32
    return %arg1, %c0_i32, %c0_i32_0 : i32, i32, i32
  }
  func.func @transform_7(%arg0: i32, %arg1: i32) -> (i32, i32, i32) {
    %c0_i32 = arith.constant 0 : i32
    %c0_i32_0 = arith.constant 0 : i32
    %c0_i32_1 = arith.constant 0 : i32
    return %arg1, %c0_i32, %c0_i32_0 : i32, i32, i32
  }
  func.func @transform_8(%arg0: i32, %arg1: i32) -> (i32, i32, i32) {
    %c0_i32 = arith.constant 0 : i32
    %c0_i32_0 = arith.constant 0 : i32
    %c0_i32_1 = arith.constant 0 : i32
    return %arg1, %c0_i32, %c0_i32_0 : i32, i32, i32
  }
  func.func @transform_9(%arg0: i32, %arg1: i32) -> (i32, i32, i32) {
    %c0_i32 = arith.constant 0 : i32
    %c0_i32_0 = arith.constant 0 : i32
    %c0_i32_1 = arith.constant 0 : i32
    return %arg1, %c0_i32, %c0_i32_0 : i32, i32, i32
  }
  func.func @transform_10(%arg0: i32, %arg1: i32) -> (i32, i32, i32) {
    %c0_i32 = arith.constant 0 : i32
    %c0_i32_0 = arith.constant 0 : i32
    %c0_i32_1 = arith.constant 0 : i32
    return %arg1, %c0_i32, %c0_i32_0 : i32, i32, i32
  }
  func.func @transform_11(%arg0: i32, %arg1: i32) -> (i32, i32, i32) {
    %c0_i32 = arith.constant 0 : i32
    %c0_i32_0 = arith.constant 0 : i32
    %c0_i32_1 = arith.constant 0 : i32
    return %arg1, %c0_i32, %c0_i32_0 : i32, i32, i32
  }
  func.func @transform_12(%arg0: i32, %arg1: i32) -> (i32, i32, i32) {
    %c0_i32 = arith.constant 0 : i32
    %c0_i32_0 = arith.constant 0 : i32
    %c0_i32_1 = arith.constant 0 : i32
    return %arg1, %c0_i32, %c0_i32_0 : i32, i32, i32
  }
  func.func @transform_13(%arg0: i32, %arg1: i32) -> (i32, i32, i32) {
    %c0_i32 = arith.constant 0 : i32
    %c0_i32_0 = arith.constant 0 : i32
    %c0_i32_1 = arith.constant 0 : i32
    return %arg1, %c0_i32, %c0_i32_0 : i32, i32, i32
  }
  func.func @transform_14(%arg0: i32, %arg1: i32) -> (i32, i32, i32) {
    %c0_i32 = arith.constant 0 : i32
    %c0_i32_0 = arith.constant 0 : i32
    %c0_i32_1 = arith.constant 0 : i32
    return %arg1, %c0_i32, %c0_i32_0 : i32, i32, i32
  }
  func.func @transform_15(%arg0: i32, %arg1: i32) -> (i32, i32, i32) {
    %c0_i32 = arith.constant 0 : i32
    %c0_i32_0 = arith.constant 0 : i32
    %c0_i32_1 = arith.constant 0 : i32
    return %arg1, %c0_i32, %c0_i32_0 : i32, i32, i32
  }
  func.func @transform_16(%arg0: i32, %arg1: i32) -> (i32, i32, i32) {
    %c0_i32 = arith.constant 0 : i32
    %c0_i32_0 = arith.constant 0 : i32
    %c0_i32_1 = arith.constant 0 : i32
    return %arg1, %c0_i32, %c0_i32_0 : i32, i32, i32
  }
  func.func @transform_17(%arg0: i32, %arg1: i32) -> (i32, i32) {
    %c0_i32 = arith.constant 0 : i32
    %c0_i32_0 = arith.constant 0 : i32
    %c0_i32_1 = arith.constant 0 : i32
    return %c0_i32, %c0_i32_0 : i32, i32
  }
  func.func @transform_18(%arg0: i32, %arg1: i32) -> (i32, i32) {
    %c0_i32 = arith.constant 0 : i32
    %c0_i32_0 = arith.constant 0 : i32
    return %arg0, %c0_i32 : i32, i32
  }
}

</mosaic_0001>

<bundles_post_ra>
// kernel: transformer_decoder_forward.1
= control target key start
LH: loop header
LB: loop body
LE: loop exit
PB: predicated region body
PF: predicated region fallthrough
CT: control target
= control target key end

     0   :  { %s2453_s27 = smov 0   ;;  %s2455_s28 = smov 0   ;;  %s2792_s0 = inlined_call_operand.vmem [shape: f32[16,32], index: 0, kind: input, shape index: {}]   ;;  %s2793_s1 = inlined_call_operand.vmem [shape: f32[16,32], index: 1, kind: input, shape index: {}]   ;;  %s2794_s2 = inlined_call_operand.vmem [shape: bf16[32,32], index: 2, kind: input, shape index: {}]   ;;  %s2795_s3 = inlined_call_operand.vmem [shape: bf16[32,32], index: 3, kind: input, shape index: {}]   ;;  %s2796_s4 = inlined_call_operand.vmem [shape: bf16[2,32,96], index: 4, kind: input, shape index: {}]   ;;  %s2797_s5 = inlined_call_operand.vmem [shape: f32[2,1,96], index: 5, kind: input, shape index: {}]   ;;  %s2798_s6 = inlined_call_operand.vmem [shape: bf16[2,32,32], index: 6, kind: input, shape index: {}]   ;;  %s2799_s7 = inlined_call_operand.vmem [shape: f32[2,1,32], index: 7, kind: input, shape index: {}]   ;;  %s2800_s8 = inlined_call_operand.vmem [shape: bf16[2,32,96], index: 8, kind: input, shape index: {}]   ;;  %s2801_s9 = inlined_call_operand.vmem [shape: f32[2,1,96], index: 9, kind: input, shape index: {}]   ;;  %s2802_s10 = inlined_call_operand.vmem [shape: bf16[2,32,32], index: 10, kind: input, shape index: {}]   ;;  %s2803_s11 = inlined_call_operand.vmem [shape: f32[2,1,32], index: 11, kind: input, shape index: {}]   ;;  %s2804_s12 = inlined_call_operand.vmem [shape: bf16[2,32,64], index: 12, kind: input, shape index: {}]   ;;  %s2805_s13 = inlined_call_operand.vmem [shape: f32[2,1,64], index: 13, kind: input, shape index: {}]   ;;  %s2806_s14 = inlined_call_operand.vmem [shape: bf16[2,64,32], index: 14, kind: input, shape index: {}]   ;;  %s2807_s15 = inlined_call_operand.vmem [shape: f32[2,1,32], index: 15, kind: input, shape index: {}]   ;;  %s2808_s16 = inlined_call_operand.vmem [shape: f32[2,6,32], index: 16, kind: input, shape index: {}]   ;;  %s2809_s17 = inlined_call_operand.vmem [shape: f32[2,32], index: 17, kind: input, shape index: {}]   ;;  %s2810_s18 = inlined_call_operand.vmem [shape: f32[16,32], index: 18, kind: output, shape index: {}]  }
   0x1   :  { %2815 = sst [smem:[#allocation10_spill]] %s2792_s0  ;;  %s2457_s29 = smov 0  }
   0x2   :  { %2816 = sst [smem:[#allocation11_spill]] %s2793_s1  ;;  %s2459_s30 = smov 0  }
   0x3   :  { %2817 = sst [smem:[#allocation12_spill]] %s2794_s2  ;;  %s2461_s0 = smov 0  }
   0x4   :  { %2818 = sst [smem:[#allocation13_spill]] %s2795_s3 }
   0x5   :  { %2819 = sst [smem:[#allocation14_spill]] %s2796_s4 }
   0x6   :  { %2820 = sst [smem:[#allocation15_spill]] %s2798_s6 }
   0x7   :  { %2821 = sst [smem:[#allocation16_spill]] %s2800_s8 }
   0x8   :  { %2822 = sst [smem:[#allocation17_spill]] %s2801_s9 }
   0x9   :  { %2823 = sst [smem:[#allocation18_spill]] %s2802_s10 }
   0xa   :  { %2824 = sst [smem:[#allocation19_spill]] %s2803_s11 }
   0xb   :  { %2825 = sst [smem:[#allocation20_spill]] %s2804_s12 }
   0xc   :  { %2826 = sst [smem:[#allocation21_spill]] %s2805_s13 }
   0xd   :  { %2827 = sst [smem:[#allocation22_spill]] %s2806_s14 }
   0xe   :  { %2828 = sst [smem:[#allocation23_spill]] %s2807_s15 }
   0xf   :  { %2829 = sst [smem:[#allocation24_spill]] %s2808_s16 }
  0x10   :  { %2830 = sst [smem:[#allocation25_spill]] %s2809_s17 }
  0x11   :  { %2831 = sst [smem:[#allocation26_spill]] %s2810_s18 }
  0x12 LB: > { %2832 = sst [smem:[#allocation3_spill]] %s2336_s29  ;;  %s37_s19 = sadd.s32 1, %s2336_s29  ;;  %s2344_s0 = sphi %s2461_s0, %s28_s0   ;;  %s2340_s30 = sphi %s2459_s30, %s2874_s30   ;;  %s2336_s29 = sphi %s2457_s29, %s2873_s29   ;;  %s2332_s28 = sphi %s2455_s28, %s2872_s28   ;;  %s2328_s27 = sphi %s2453_s27, %s2871_s27  }
  0x13   : > { %2833 = sst [smem:[#allocation4_spill]] %s2340_s30  ;;  %s40_s1 = sadd.s32 1, %s2340_s30 }
  0x14   : > { %2834 = sst [smem:[#allocation5_spill]] %s2344_s0  ;;  %p38_p0 = scmp.ge.s32.totalorder %s37_s19, 2 }
  0x15   : > { %p2070_p1 = scmp.ge.s32.totalorder %s2344_s0, 1  ;;  %p671_p2 = scmp.lt.s32.totalorder %s2344_s0, 5 }
  0x16   : > { %s2876_s19 = smov (%p38_p0, %s37_s19), 0  ;;  %s2878_s1 = smov (!%p38_p0, %s40_s1), %s2340_s30 }
  0x17   : > { %2835 = sst [smem:[#allocation6_spill]] %s2876_s19  ;;  %p672_p3 = pnand %p2070_p1, %p671_p2 }
  0x18   : > { %p42_p4 = scmp.ge.s32.totalorder %s2878_s1, 2 }
  0x19   : > { %675 = sbr.rel (%p672_p3) target bundleno = 3893 (0xf35), region = 92 }
  0x1a   : > { %s2880_s1 = smov (%p42_p4, %s2878_s1), 0 }
  0x1b   : > { %2836 = sst [smem:[#allocation7_spill]] %s2880_s1 }
  0x1e   : > { %p789_p5 = scmp.lt.s32.totalorder %s2332_s28, 1  ;;  %s2073_s20 = sshll.u32 %s2332_s28, 1 }
  0x1f   : > { %p798_p6 = scmp.lt.s32.totalorder %s2073_s20, 3  ;;  %p809_p7 = scmp.lt.s32.totalorder %s2328_s27, 1 }
  0x20   : > { %s2882_s28 = smov (!%p789_p5, %s2332_s28), 1  ;;  %s2837_s23 = sld [smem:[#allocation10_spill]] }
  0x21   : > { %s2884_s20 = smov (!%p798_p6, %s2073_s20), 3  ;;  %s2485_s21 = sshll.u32 %s2882_s28, 3 }
  0x22   : > { %s2074_s30 = sshll.u32 %s2884_s20, 2  ;;  %s2840_s15 = sld [smem:[#allocation12_spill]] }
  0x23   : > { %s2842_s3 = sld [smem:[#allocation13_spill]]  ;;  %p2091_p8 = scmp.ne.s32.totalorder %s2328_s27, 0 }
  0x24   : > { %s2511_s22 = scalar_select %p809_p7, %s2328_s27, 1 }
  0x25   : > { %s2843_s4 = sld [smem:[#allocation14_spill]] }
  0x26   : > { %s792_s24 = scalar_lea.vmem %s2837_s23, %s2485_s21  ;;  %s2184_s29 = sshll.u32 %s2511_s22, 4 }
  0x27   : > { %s2844_s6 = sld [smem:[#allocation15_spill]]  ;;  %s2189_s16 = sshll.u32 %s2511_s22, 5 }
  0x28   : > { %s2503_s14 = scalar_lea.vmem %s2840_s15, %s2074_s30  ;;  %s2845_s8 = sld [smem:[#allocation16_spill]] }
  0x29   : > { %2841 = sst [smem:[#allocation8_spill]] %s2503_s14  ;;  %s2508_s11 = scalar_lea.vmem %s2842_s3, %s2074_s30 }
  0x2a   : > { %s2847_s10 = sld [smem:[#allocation18_spill]] }
  0x2b   : > { %s813_s13 = scalar_lea.vmem %s2843_s4, %s2184_s29  ;;  %s2850_s26 = sld [smem:[#allocation20_spill]] }
  0x2c   : > { %s2852_s9 = sld [smem:[#allocation22_spill]]  ;;  %s2089_s4 = sshll.u32 %s2511_s22, 3 }
  0x2d   : > { %s2524_s2 = scalar_lea.vmem %s2844_s6, %s2184_s29  ;;  %s2854_s23 = sld [smem:[#allocation24_spill]] }
  0x2e   : > { %s2533_s19 = scalar_lea.vmem %s2845_s8, %s2184_s29  ;;  %s2851_s8 = sld [smem:[#allocation21_spill]] }
  0x30   : > { %s2542_s3 = scalar_lea.vmem %s2847_s10, %s2184_s29 }
  0x31   : > { %2848 = sst [smem:[#allocation9_spill]] %s2542_s3  ;;  %s2551_s18 = scalar_lea.vmem %s2850_s26, %s2184_s29 }
  0x32   : > { %s2561_s1 = scalar_lea.vmem %s2852_s9, %s2189_s16  ;;  %s2853_s3 = sld [smem:[#allocation23_spill]] }
  0x33   : > { %s2571_s29 = scalar_lea.vmem %s2854_s23, %s2089_s4 }
  0x34   : > { %s848_s14 = scalar_lea.vmem %s2851_s8, %s2511_s22  ;;  %869 = sbr.rel (%p2091_p8) target bundleno = 59 (0x3b), region = 96 }
  0x38   : > { %s856_s30 = scalar_lea.vmem %s2853_s3, %s2511_s22 }
  0x39   : > { %v870_v0 = vld [vmem:[%s792_s24] sm:$0xff]  ;;  %vm871_vm0 = vcmask 261120  }
  0x3a   : > { %872 = vst.msk [vmem:[#allocation2] sm:$0xff] %vm871_vm0, %v870_v0 }
  0x3b PF: > { %v2191_v1 = vld [vmem:[%s813_s13 + $0x8] sm:$0xff]  ;;  %v2190_v3 = vld [vmem:[%s813_s13] sm:$0xff]  ;;  %s2855_s9 = sld [smem:[#allocation11_spill]]  ;;  %vm899_vm1 = vcmask 261120   ;;  %s2857_s0 = scalar_lea.vmem %s2797_s5, %s2511_s22  ;;  %vm950_vm2 = vcmask 64512   ;;  %vm985_vm3 = vcmask 1043456  }
  0x3c   : > { %909 = vmatpush.bf16.msra.mxu0 %v2191_v1  ;;  %v2258_v7 = vld [vmem:[%s2857_s0] ss:$0 sm:$0xff]  ;;  %s2346_s13 = smov 64   ;;  %s2347_s26 = smov 96   ;;  %vm1189_vm4 = vcmask 130048   ;;  %vm1191_vm5 = vcmask 195584  }
  0x3d   : > { %916 = vrot.lane.b32.xlu1 %v2190_v3, %s2346_s13  ;;  %922 = vrot.lane.b32.xlu2 %v2258_v7, %s2346_s13  ;;  %s2348_s25 = smov 88   ;;  %s2349_s17 = smov 120   ;;  %vm1751_vm13 = vcmask 523264  }
  0x3e   : > { %s2350_s28 = smov 80   ;;  %s2351_s16 = smov 112  }
  0x3f   : > { %s2352_s15 = smov 72   ;;  %s2353_s12 = smov 104  }
  0x40   : > { %910 = vmatpush.bf16.msra.mxu0 %v2190_v3  ;;  %s2354_s4 = smov 8   ;;  %s2355_s20 = smov 16  }
  0x41   : > { %v2574_v2 = vld [vmem:[#allocation2] sm:$0xff]  ;;  %s2856_s10 = scalar_lea.vmem %s2855_s9, %s2485_s21  ;;  %s2356_s23 = smov 24  }
  0x42   : > { %v2581_v4 = vld [vmem:[%s2856_s10] sm:$0xff]  ;;  %v883_v22 = vpack.c.bf16 %v2574_v2, %v2574_v2  ;;  %s2858_s8 = scalar_lea.vmem %s2799_s7, %s2511_s22  ;;  %s2859_s10 = sld [smem:[#allocation17_spill]] }
  0x43   : > { %v881_v5 = vadd.f32 %v2581_v4, %v2574_v2  ;;  %p2181_p9 = scmp.ne.s32.totalorder %s2328_s27, 1 }
  0x45   : > { %v882_v6 = vpack.c.bf16 %v881_v5, %v881_v5 }
  0x47   : > { %2100 = vmatmul.msk.bf16.vlgmr.msra.gmra.mxu0 %vm899_vm1, %v882_v6 }
  0x48   : > { %s2860_s6 = scalar_lea.vmem %s2859_s10, %s2511_s22 }
  0x97   : > { %v923_v28 = vpop.permute.xlu2 %922 }
  0xaf   : > { %v917_v21 = vpop.permute.xlu1 %916 }
  0xc4   : > { %v912_v8 = vpop.f32.mrf.mxu0 }
  0xc5   : > { %v913_v9 = vadd.f32 %v2258_v7, %v912_v8 }
  0xc7   : > { %v943_v10 = vpack.c.bf16 %v913_v9, %v913_v9  ;;  %v941_v14 = vmul.f32 0.35355338, %v913_v9 }
  0xc9   : > { %v946_v11 = vunpack.c.l.b16 %v943_v10  ;;  %v942_v15 = vpack.c.bf16 %v941_v14, %v941_v14 }
  0xcb   : > { %v947_v12 = vpack.c.b16 %v946_v11, %v946_v11  ;;  %v1003_v16 = vunpack.c.l.b16 %v942_v15 }
  0xcc   : > { %v914_v13 = vpop.f32.mrf.mxu0 }
  0xcd   : > { %948 = vrot.lane.b32.xlu0 %v947_v12, %s2347_s26  ;;  %v1004_v17 = vpack.c.b16 %v1003_v16, %v1003_v16 }
  0xd5   : > { %918 = vrot.lane.b32.xlu0 %v2191_v1, %s2346_s13 }
  0xdd   : > { %1007 = vrot.lane.b32.xlu0 %v947_v12, %s2348_s25 }
  0xe5   : > { %1005 = vrot.lane.b32.xlu0 %v1004_v17, %s2349_s17 }
  0xed   : > { %1066 = vrot.lane.b32.xlu0 %v947_v12, %s2350_s28 }
  0xf5   : > { %1064 = vrot.lane.b32.xlu0 %v1004_v17, %s2351_s16 }
 0x13f   : > { %v949_v18 = vpop.permute.xlu0 %948 }
 0x140   : > { %v955_v19 = vsel %vm950_vm2, %v949_v18, 0 }
 0x141   : > { %964 = vmatpush.bf16.xpose.msra.mxu2 %v955_v19 }
 0x147   : > { %v919_v20 = vpop.permute.xlu0 %918 }
 0x148   : > { %934 = vmatpush.bf16.msra.mxu1 %v919_v20  ;;  %2102 = vmatmul.msk.bf16.vlgmr.msra.gmra.mxu2 %vm950_vm2, %v942_v15 }
 0x14c   : > { %935 = vmatpush.bf16.msra.mxu1 %v917_v21 }
 0x14f   : > { %2101 = vmatmul.msk.bf16.vlgmr.msra.gmra.mxu1 %vm899_vm1, %v883_v22  ;;  %v1008_v23 = vpop.permute.xlu0 %1007 }
 0x150   : > { %v1013_v35 = vsel %vm950_vm2, %v1008_v23, 0 }
 0x157   : > { %v1006_v24 = vpop.permute.xlu0 %1005 }
 0x15f   : > { %v1067_v25 = vpop.permute.xlu0 %1066 }
 0x160   : > { %v1072_v26 = vsel %vm950_vm2, %v1067_v25, 0 }
 0x161   : > { %1081 = vmatpush.bf16.xpose.msrb.mxu1 %v1072_v26 }
 0x167   : > { %v1065_v27 = vpop.permute.xlu0 %1064 }
 0x168   : > { %2106 = vmatmul.msk.bf16.vlgmr.msrb.gmra.mxu1 %vm950_vm2, %v1065_v27 }
 0x1cb   : > { %v966_v29 = vpop.f32.mrf.mxu2 }
 0x1cc   : > { %v937_v30 = vpop.f32.mrf.mxu1  ;;  %v970_v31 = vsel %vm950_vm2, %v966_v29, -inf }
 0x1cd   : > { %v938_v32 = vadd.f32 %v937_v30, %v923_v28  ;;  %971 = vmax.xlane.f32.xlu1 %v970_v31 }
 0x1cf   : > { %v944_v33 = vpack.c.bf16 %v938_v32, %v938_v32 }
 0x1d1   : > { %v987_v34 = vsel %vm985_vm3, %v944_v33, 0  ;;  %v1041_v58 = vunpack.c.l.b16 %v944_v33 }
 0x1d2   : > { %996 = vmatpush.bf16.msra.mxu3 %v987_v34 }
 0x1d3   : > { %v968_v36 = vpop.f32.mrf.mxu2  ;;  %v1042_v59 = vpack.c.b16 %v1041_v58, %v1041_v58  ;;  %v2194_v58 = vld [vmem:[%s2533_s19] sm:$0xff] }
 0x1d4   : > { %v939_v37 = vpop.f32.mrf.mxu1 }
 0x1d6   : > { %1022 = vmatpush.bf16.xpose.msrb.mxu3 %v1013_v35 }
 0x1e5   : > { %v1083_v38 = vpop.f32.mrf.mxu1 }
 0x1e6   : > { %v1087_v45 = vsel %vm950_vm2, %v1083_v38, -inf }
 0x1ed   : > { %v1085_v39 = vpop.f32.mrf.mxu1 }
 0x240   : > { %v972_v40 = vpop.xlane.xlu1 %971 }
 0x241   : > { %v973_v41 = vsub.f32 %v966_v29, %v972_v40  ;;  %v2193_v40 = vld [vmem:[%s2524_s2 + $0x8] sm:$0xff] }
 0x242   : > { %1223 = vmatpush.bf16.msra.mxu1 %v2193_v40 }
 0x243   : > { %v974_v42 = vmul.f32 1.442695, %v973_v41  ;;  %v2192_v41 = vld [vmem:[%s2524_s2] sm:$0xff] }
 0x245   : > { %2264 = vpow2.f32 %v974_v42 }
 0x246   : > { %1224 = vmatpush.bf16.msra.mxu1 %v2192_v41 }
 0x24b   : > { %v2265_v43 = vpop.eup %2264 }
 0x24c   : > { %v976_v44 = vsel %vm950_vm2, %v2265_v43, 0.0 }
 0x24d   : > { %977 = vadd.xlane.f32.xlu2 %v976_v44 }
 0x265   : > { %1122 = vrot.lane.b32.xlu2 %v947_v12, %s2352_s15 }
 0x26d   : > { %1120 = vrot.lane.b32.xlu2 %v1004_v17, %s2353_s12 }
 0x296   : > { %1088 = vmax.xlane.f32.xlu2 %v1087_v45 }
 0x2c0   : > { %v978_v46 = vpop.xlane.xlu2 %977 }
 0x2c1   : > { %2266 = vrcp.f32 %v978_v46 }
 0x2c7   : > { %v2267_v47 = vpop.eup %2266 }
 0x2c8   : > { %v980_v48 = vmul.f32 %v2267_v47, %v2265_v43  ;;  %v1123_v49 = vpop.permute.xlu2 %1122 }
 0x2c9   : > { %v1128_v51 = vsel %vm950_vm2, %v1123_v49, 0  ;;  %v2259_v49 = vld [vmem:[%s2858_s8] ss:$0 sm:$0xff] }
 0x2ca   : > { %v981_v50 = vpack.c.bf16 %v980_v48, %v980_v48 }
 0x2cc   : > { %2103 = vmatmul.msk.bf16.vlgmr.msra.gmra.mxu3 %vm950_vm2, %v981_v50 }
 0x2cd   : > { %1137 = vmatpush.bf16.xpose.msra.mxu3 %v1128_v51 }
 0x2d0   : > { %v1121_v52 = vpop.permute.xlu2 %1120 }
 0x2dc   : > { %2104 = vmatmul.msk.bf16.vlgmr.msrb.gmra.mxu3 %vm950_vm2, %v1006_v24 }
 0x2ec   : > { %2108 = vmatmul.msk.bf16.vlgmr.msra.gmra.mxu3 %vm950_vm2, %v1121_v52 }
 0x309   : > { %v1089_v53 = vpop.xlane.xlu2 %1088 }
 0x30a   : > { %v1090_v54 = vsub.f32 %v1083_v38, %v1089_v53 }
 0x30c   : > { %v1091_v55 = vmul.f32 1.442695, %v1090_v54 }
 0x30e   : > { %2268 = vpow2.f32 %v1091_v55  ;;  %v2357_v55 = vmov 32.0  }
 0x314   : > { %v2269_v56 = vpop.eup %2268 }
 0x315   : > { %v1093_v57 = vsel %vm950_vm2, %v2269_v56, 0.0 }
 0x316   : > { %1094 = vadd.xlane.f32.xlu2 %v1093_v57 }
 0x32e   : > { %1155 = vrot.lane.b32.xlu2 %v1042_v59, %s2353_s12 }
 0x34f   : > { %v2616_v60 = vpop.f32.mrf.mxu3 }
 0x357   : > { %v1000_v61 = vpop.f32.mrf.mxu3 }
 0x35f   : > { %v1024_v62 = vpop.f32.mrf.mxu3 }
 0x360   : > { %v1028_v63 = vsel %vm950_vm2, %v1024_v62, -inf }
 0x361   : > { %1029 = vmax.xlane.f32.xlu0 %v1028_v63 }
 0x367   : > { %v1026_v0 = vpop.f32.mrf.mxu3 }
 0x36f   : > { %v1139_v1 = vpop.f32.mrf.mxu3 }
 0x370   : > { %v1143_v3 = vsel %vm950_vm2, %v1139_v1, -inf }
 0x371   : > { %1144 = vmax.xlane.f32.xlu1 %v1143_v3 }
 0x377   : > { %v1141_v5 = vpop.f32.mrf.mxu3 }
 0x389   : > { %v1095_v16 = vpop.xlane.xlu2 %1094 }
 0x38a   : > { %1043 = vrot.lane.b32.xlu1 %v1042_v59, %s2349_s17 }
 0x391   : > { %v1156_v17 = vpop.permute.xlu2 %1155 }
 0x392   : > { %v1161_v20 = vsel %vm985_vm3, %v1156_v17, 0  ;;  %v2672_v17 = vld [vmem:[%s2571_s29] sm:$0x3f]  ;;  %s2862_s29 = sld [smem:[#allocation9_spill]] }
 0x3d4   : > { %v1030_v6 = vpop.xlane.xlu0 %1029 }
 0x3d5   : > { %v1031_v7 = vsub.f32 %v1024_v62, %v1030_v6 }
 0x3d7   : > { %v1032_v8 = vmul.f32 1.442695, %v1031_v7 }
 0x3d9   : > { %2270 = vpow2.f32 %v1032_v8  ;;  %v2196_v8 = vld [vmem:[%s2508_s11] sm:$0xff]  ;;  %s2861_s11 = sld [smem:[#allocation8_spill]] }
 0x3df   : > { %v2271_v9 = vpop.eup %2270 }
 0x3e0   : > { %v1034_v10 = vsel %vm950_vm2, %v2271_v9, 0.0 }
 0x3e1   : > { %1035 = vadd.xlane.f32.xlu1 %v1034_v10 }
 0x3e4   : > { %v1145_v11 = vpop.xlane.xlu1 %1144 }
 0x3e5   : > { %v1146_v12 = vsub.f32 %v1139_v1, %v1145_v11  ;;  %v2667_v11 = vld [vmem:[%s2860_s6] ss:$0 sm:$0xff] }
 0x3e7   : > { %v1147_v13 = vmul.f32 1.442695, %v1146_v12 }
 0x3e9   : > { %2272 = vpow2.f32 %v1147_v13 }
 0x3ef   : > { %v2273_v14 = vpop.eup %2272 }
 0x3f0   : > { %v1149_v15 = vsel %vm950_vm2, %v2273_v14, 0.0 }
 0x3f1   : > { %1150 = vadd.xlane.f32.xlu0 %v1149_v15 }
 0x3fa   : > { %1099 = vrot.lane.b32.xlu1 %v1042_v59, %s2351_s16 }
 0x3fc   : > { %v1044_v18 = vpop.permute.xlu1 %1043 }
 0x3fd   : > { %v1049_v19 = vsel %vm985_vm3, %v1044_v18, 0 }
 0x3fe   : > { %1058 = vmatpush.bf16.msrb.mxu0 %v1049_v19 }
 0x402   : > { %1170 = vmatpush.bf16.msra.mxu0 %v1161_v20  ;;  %v1260_v20 = vperm.slane %v2672_v17, 0 }
 0x454   : > { %v1036_v21 = vpop.xlane.xlu1 %1035 }
 0x455   : > { %2274 = vrcp.f32 %v1036_v21 }
 0x456   : > { %2276 = vrcp.f32 %v1095_v16 }
 0x45b   : > { %v2275_v22 = vpop.eup %2274 }
 0x45c   : > { %v1038_v23 = vmul.f32 %v2275_v22, %v2271_v9  ;;  %v2277_v26 = vpop.eup %2276  ;;  %v1262_v22 = vperm.slane %v2672_v17, 1 }
 0x45d   : > { %v1097_v28 = vmul.f32 %v2277_v26, %v2269_v56  ;;  %v2648_v56 = vld [vmem:[%s2533_s19 + $0x8] sm:$0xff] }
 0x45e   : > { %v1039_v24 = vpack.c.bf16 %v1038_v23, %v1038_v23  ;;  %1311 = vrot.lane.b32.xlu2 %v2648_v56, %s2347_s26 }
 0x45f   : > { %v1098_v33 = vpack.c.bf16 %v1097_v28, %v1097_v28 }
 0x460   : > { %2105 = vmatmul.msk.bf16.vlgmr.msrb.gmra.mxu0 %vm950_vm2, %v1039_v24 }
 0x464   : > { %v1151_v25 = vpop.xlane.xlu0 %1150 }
 0x465   : > { %2278 = vrcp.f32 %v1151_v25 }
 0x466   : > { %2280 = vrcp.f32 %v2357_v55  ;;  %1309 = vrot.lane.b32.xlu2 %v2194_v58, %s2347_s26 }
 0x46b   : > { %v2279_v27 = vpop.eup %2278 }
 0x46c   : > { %v1153_v29 = vmul.f32 %v2279_v27, %v2273_v14  ;;  %v1100_v30 = vpop.permute.xlu1 %1099  ;;  %v2281_v57 = vpop.eup %2280 }
 0x46d   : > { %v1105_v31 = vsel %vm985_vm3, %v1100_v30, 0  ;;  %v1235_v59 = vmul.f32 32.0, %v2281_v57  ;;  %vm1239_vm6 = vweird.f32 %v2281_v57 }
 0x46e   : > { %v1154_v32 = vpack.c.bf16 %v1153_v29, %v1153_v29  ;;  %1114 = vmatpush.bf16.msrb.mxu2 %v1105_v31  ;;  %1315 = vrot.lane.b32.xlu2 %v2667_v11, %s2347_s26 }
 0x470   : > { %2109 = vmatmul.msk.bf16.vlgmr.msra.gmra.mxu0 %vm950_vm2, %v1154_v32 }
 0x471   : > { %2107 = vmatmul.msk.bf16.vlgmr.msrb.gmra.mxu2 %vm950_vm2, %v1098_v33 }
 0x472   : > { %1295 = vmatpush.bf16.msra.mxu2 %v2648_v56 }
 0x476   : > { %1296 = vmatpush.bf16.msra.mxu2 %v2194_v58 }
 0x4b8   : > { %v1312_v6 = vpop.permute.xlu2 %1311 }
 0x4b9   : > { %1327 = vmatpush.bf16.msrb.mxu3 %v1312_v6 }
 0x4c0   : > { %v1310_v7 = vpop.permute.xlu2 %1309 }
 0x4c1   : > { %1328 = vmatpush.bf16.msrb.mxu3 %v1310_v7 }
 0x4c4   : > { %2132 = vmatmul.msk.bf16.vlgmr.msrb.gmra.mxu3 %vm899_vm1, %v2196_v8 }
 0x4c8   : > { %v1316_v29 = vpop.permute.xlu2 %1315 }
 0x4dd   : > { %v1060_v34 = vpop.f32.mrf.mxu0 }
 0x4de   : > { %1177 = vrot.lane.b32.xlu0 %v1060_v34, %s2354_s4 }
 0x4e5   : > { %v1062_v35 = vpop.f32.mrf.mxu0 }
 0x4ed   : > { %v1172_v36 = vpop.f32.mrf.mxu0 }
 0x4f4   : > { %v1116_v37 = vpop.f32.mrf.mxu2 }
 0x4f5   : > { %v1174_v38 = vpop.f32.mrf.mxu0  ;;  %1181 = vrot.lane.b32.xlu1 %v1116_v37, %s2355_s20 }
 0x4fc   : > { %v1118_v39 = vpop.f32.mrf.mxu2 }
 0x4fd   : > { %1185 = vrot.lane.b32.xlu1 %v1172_v36, %s2356_s23 }
 0x547   : > { %v1330_v28 = vpop.f32.mrf.mxu3 }
 0x548   : > { %v1331_v30 = vadd.f32 %v1330_v28, %v1316_v29 }
 0x54a   : > { %v1370_v32 = vpack.c.bf16 %v1331_v30, %v1331_v30 }
 0x54c   : > { %v1376_v35 = vunpack.c.l.b16 %v1370_v32 }
 0x54f   : > { %v1332_v31 = vpop.f32.mrf.mxu3 }
 0x550   : > { %v1178_v43 = vpop.permute.xlu0 %1177  ;;  %v1333_v33 = vadd.f32 %v1332_v31, %v1316_v29 }
 0x551   : > { %v1188_v44 = vsel %vm950_vm2, %v2616_v60, %v1178_v43  ;;  %v1236_v60 = vsub.f32 1.0, %v1235_v59 }
 0x552   : > { %v1371_v34 = vpack.c.bf16 %v1333_v33, %v1333_v33 }
 0x554   : > { %v1377_v36 = vunpack.c.l.b16 %v1371_v34 }
 0x556   : > { %v1378_v37 = vpack.c.b16 %v1377_v36, %v1376_v35 }
 0x558   : > { %1437 = vrot.lane.b32.xlu2 %v1378_v37, %s2349_s17  ;;  %v1383_v38 = vsel %vm950_vm2, %v1378_v37, 0 }
 0x559   : > { %1392 = vmatpush.bf16.xpose.msrb.mxu1 %v1383_v38 }
 0x567   : > { %v1182_v42 = vpop.permute.xlu1 %1181 }
 0x568   : > { %v1190_v45 = vsel %vm1189_vm4, %v1188_v44, %v1182_v42 }
 0x56f   : > { %v1186_v46 = vpop.permute.xlu1 %1185 }
 0x570   : > { %v1192_v47 = vsel %vm1191_vm5, %v1190_v45, %v1186_v46 }
 0x571   : > { %v1193_v48 = vpack.c.bf16 %v1192_v47, %v1192_v47 }
 0x573   : > { %2118 = vmatmul.msk.bf16.vlgmr.msra.gmra.mxu1 %vm899_vm1, %v1193_v48 }
 0x5b2   : > { %v1438_v45 = vpop.permute.xlu2 %1437 }
 0x5b3   : > { %v1443_v46 = vsel %vm950_vm2, %v1438_v45, 0 }
 0x5b4   : > { %1452 = vmatpush.bf16.xpose.msra.mxu3 %v1443_v46 }
 0x5f0   : > { %v1226_v50 = vpop.f32.mrf.mxu1 }
 0x5f1   : > { %v1227_v51 = vadd.f32 %v2259_v49, %v1226_v50 }
 0x5f3   : > { %v1230_v52 = vadd.f32 %v1227_v51, %v2574_v2  ;;  %v1237_v2 = vmul.f32 %v2281_v57, %v1236_v60 }
 0x5f5   : > { %v1231_v53 = vsel %vm899_vm1, %v1230_v52, 0.0  ;;  %v1238_v61 = vadd.f32 %v2281_v57, %v1237_v2 }
 0x5f6   : > { %1232 = vadd.xlane.f32.xlu1 %v1231_v53 }
 0x5f7   : > { %v2655_v62 = vsel %vm1239_vm6, %v2281_v57, %v1238_v61 }
 0x5f8   : > { %v1228_v54 = vpop.f32.mrf.mxu1 }
 0x60f   : > { %1491 = vrot.lane.b32.xlu1 %v1378_v37, %s2351_s16 }
 0x669   : > { %v1233_v63 = vpop.xlane.xlu1 %1232 }
 0x66a   : > { %v1241_v0 = vmul.f32 %v2655_v62, %v1233_v63 }
 0x66c   : > { %v1242_v1 = vsub.f32 %v1230_v52, %v1241_v0 }
 0x66e   : > { %v1243_v3 = vmul.f32 %v1242_v1, %v1242_v1 }
 0x670   : > { %v1244_v5 = vsel %vm899_vm1, %v1243_v3, 0.0 }
 0x671   : > { %1245 = vadd.xlane.f32.xlu0 %v1244_v5 }
 0x681   : > { %v1492_v47 = vpop.permute.xlu1 %1491 }
 0x682   : > { %v1497_v49 = vsel %vm950_vm2, %v1492_v47, 0 }
 0x683   : > { %1506 = vmatpush.bf16.xpose.msra.mxu1 %v1497_v49 }
 0x685   : > { %1545 = vrot.lane.b32.xlu0 %v1378_v37, %s2353_s12 }
 0x68d   : > { %1342 = vrot.lane.b32.xlu0 %v2194_v58, %s2346_s13 }
 0x6e4   : > { %v1246_v9 = vpop.xlane.xlu0 %1245 }
 0x6e5   : > { %v1247_v10 = vmul.f32 %v1246_v9, %v2655_v62 }
 0x6e7   : > { %v1248_v12 = vadd.f32 1e-05, %v1247_v10 }
 0x6e9   : > { %2282 = vrsqrt.f32 %v1248_v12  ;;  %vm1255_vm8 = vweird.f32 %v1248_v12 }
 0x6ef   : > { %v2283_v13 = vpop.eup %2282 }
 0x6f0   : > { %v1250_v14 = vmul.f32 %v2283_v13, %v1248_v12  ;;  %vm1256_vm7 = vweird.f32 %v2283_v13 }
 0x6f1   : > { %vm1257_vm9 = vmor %vm1255_vm8, %vm1256_vm7 }
 0x6f2   : > { %v1251_v15 = vmul.f32 %v2283_v13, %v1250_v14 }
 0x6f4   : > { %v1252_v16 = vmul.f32 0.5, %v1251_v15 }
 0x6f6   : > { %v1253_v18 = vsub.f32 1.5, %v1252_v16 }
 0x6f7   : > { %v1546_v48 = vpop.permute.xlu0 %1545 }
 0x6f8   : > { %v1254_v19 = vmul.f32 %v2283_v13, %v1253_v18  ;;  %v1551_v50 = vsel %vm950_vm2, %v1546_v48, 0 }
 0x6f9   : > { %1560 = vmatpush.bf16.xpose.msrb.mxu3 %v1551_v50 }
 0x6fa   : > { %v1258_v21 = vsel %vm1257_vm9, %v2283_v13, %v1254_v19 }
 0x6fb   : > { %v1259_v23 = vmul.f32 %v1258_v21, %v1242_v1 }
 0x6fd   : > { %v1261_v24 = vmul.f32 %v1260_v20, %v1259_v23 }
 0x6ff   : > { %v2676_v25 = vadd.f32 %v1262_v22, %v1261_v24  ;;  %v1343_v55 = vpop.permute.xlu0 %1342 }
 0x701   : > { %v1269_v26 = vadd.f32 %v2676_v25, %v2581_v4 }
 0x703   : > { %v1270_v27 = vpack.c.bf16 %v1269_v26, %v1269_v26 }
 0x705   : > { %2127 = vmatmul.msk.bf16.vlgmr.msra.gmra.mxu2 %vm899_vm1, %v1270_v27 }
 0x788   : > { %v1298_v4 = vpop.f32.mrf.mxu2 }
 0x789   : > { %v1299_v39 = vadd.f32 %v2667_v11, %v1298_v4 }
 0x78b   : > { %v1368_v40 = vmul.f32 0.35355338, %v1299_v39 }
 0x78d   : > { %v1369_v41 = vpack.c.bf16 %v1368_v40, %v1368_v40 }
 0x78f   : > { %v1433_v42 = vunpack.c.l.b16 %v1369_v41  ;;  %2138 = vmatmul.msk.bf16.vlgmr.msrb.gmra.mxu1 %vm950_vm2, %v1369_v41 }
 0x790   : > { %v1300_v43 = vpop.f32.mrf.mxu2 }
 0x791   : > { %v1434_v44 = vpack.c.b16 %v1433_v42, %v1433_v42 }
 0x793   : > { %1435 = vrot.lane.b32.xlu2 %v1434_v44, %s2349_s17 }
 0x79b   : > { %1489 = vrot.lane.b32.xlu2 %v1434_v44, %s2351_s16 }
 0x7a3   : > { %1543 = vrot.lane.b32.xlu2 %v1434_v44, %s2353_s12 }
 0x7ab   : > { %1344 = vrot.lane.b32.xlu2 %v2648_v56, %s2346_s13  ;;  %v2197_v56 = vld [vmem:[%s2861_s11] sm:$0xff] }
 0x7ed   : > { %v1436_v51 = vpop.permute.xlu2 %1435 }
 0x7ee   : > { %2140 = vmatmul.msk.bf16.vlgmr.msra.gmra.mxu3 %vm950_vm2, %v1436_v51 }
 0x7f5   : > { %v1490_v52 = vpop.permute.xlu2 %1489 }
 0x7f6   : > { %2142 = vmatmul.msk.bf16.vlgmr.msra.gmra.mxu1 %vm950_vm2, %v1490_v52 }
 0x7fd   : > { %v1544_v53 = vpop.permute.xlu2 %1543 }
 0x7fe   : > { %2144 = vmatmul.msk.bf16.vlgmr.msrb.gmra.mxu3 %vm950_vm2, %v1544_v53 }
 0x805   : > { %v1345_v54 = vpop.permute.xlu2 %1344 }
 0x806   : > { %1360 = vmatpush.bf16.msrb.mxu0 %v1345_v54 }
 0x80a   : > { %1361 = vmatpush.bf16.msrb.mxu0 %v1343_v55 }
 0x80c   : > { %v1394_v57 = vpop.f32.mrf.mxu1 }
 0x80d   : > { %v1398_v58 = vsel %vm1189_vm4, %v1394_v57, -inf  ;;  %2137 = vmatmul.msk.bf16.vlgmr.msrb.gmra.mxu0 %vm899_vm1, %v2197_v56 }
 0x80e   : > { %1399 = vmax.xlane.f32.xlu1 %v1398_v58 }
 0x814   : > { %v1396_v59 = vpop.f32.mrf.mxu1 }
 0x827   : > { %1348 = vrot.lane.b32.xlu1 %v2667_v11, %s2346_s13  ;;  %s2863_s13 = sld [smem:[#allocation19_spill]] }
 0x82d   : > { %s2864_s26 = scalar_lea.vmem %s2863_s13, %s2511_s22  ;;  %s2867_s22 = sld [smem:[#allocation25_spill]] (!%p2181_p9) }
 0x871   : > { %v1454_v60 = vpop.f32.mrf.mxu3 }
 0x872   : > { %v1458_v2 = vsel %vm1189_vm4, %v1454_v60, -inf }
 0x873   : > { %1459 = vmax.xlane.f32.xlu2 %v1458_v2  ;;  %v1508_v61 = vpop.f32.mrf.mxu1 }
 0x874   : > { %v1512_v63 = vsel %vm1189_vm4, %v1508_v61, -inf }
 0x875   : > { %1513 = vmax.xlane.f32.xlu0 %v1512_v63 }
 0x879   : > { %v1456_v0 = vpop.f32.mrf.mxu3 }
 0x87b   : > { %v1510_v1 = vpop.f32.mrf.mxu1 }
 0x87c   : > { %v2199_v1 = vld [vmem:[%s2862_s29 + $0x8] sm:$0xff] }
 0x87d   : > { %1642 = vmatpush.bf16.msrb.mxu1 %v2199_v1 }
 0x881   : > { %v1562_v3 = vpop.f32.mrf.mxu3  ;;  %v1400_v8 = vpop.xlane.xlu1 %1399 }
 0x882   : > { %v1566_v5 = vsel %vm1189_vm4, %v1562_v3, -inf  ;;  %v1401_v19 = vsub.f32 %v1394_v57, %v1400_v8 }
 0x883   : > { %1567 = vmax.xlane.f32.xlu2 %v1566_v5 }
 0x884   : > { %v1402_v20 = vmul.f32 1.442695, %v1401_v19 }
 0x886   : > { %2284 = vpow2.f32 %v1402_v20 }
 0x889   : > { %v1564_v6 = vpop.f32.mrf.mxu3 }
 0x88a   : > { %v1363_v7 = vpop.f32.mrf.mxu0 }
 0x88c   : > { %v2285_v21 = vpop.eup %2284 }
 0x88d   : > { %v1404_v22 = vsel %vm1189_vm4, %v2285_v21, 0.0 }
 0x892   : > { %v1365_v9 = vpop.f32.mrf.mxu0 }
 0x899   : > { %v1349_v10 = vpop.permute.xlu1 %1348 }
 0x89a   : > { %v1364_v11 = vadd.f32 %v1363_v7, %v1349_v10  ;;  %v1366_v12 = vadd.f32 %v1365_v9, %v1349_v10 }
 0x89c   : > { %v1372_v13 = vpack.c.bf16 %v1364_v11, %v1364_v11  ;;  %v1373_v14 = vpack.c.bf16 %v1366_v12, %v1366_v12  ;;  %v2261_v12 = vld [vmem:[%s2864_s26] ss:$0 sm:$0xff] }
 0x89e   : > { %v1412_v15 = vunpack.c.l.b16 %v1372_v13  ;;  %v1413_v16 = vunpack.c.l.b16 %v1373_v14 }
 0x8a0   : > { %v1414_v18 = vpack.c.b16 %v1413_v16, %v1412_v15 }
 0x8a2   : > { %1470 = vrot.lane.b32.xlu0 %v1414_v18, %s2349_s17  ;;  %1426 = vmatpush.bf16.msrb.mxu2 %v1414_v18 }
 0x8cc   : > { %1405 = vadd.xlane.f32.xlu0 %v1404_v22 }
 0x8e0   : > { %1578 = vrot.lane.b32.xlu0 %v1414_v18, %s2353_s12  ;;  %s2868_s12 = sld [smem:[#allocation26_spill]] (!%p2181_p9) }
 0x8e6   : > { %v1460_v23 = vpop.xlane.xlu2 %1459 }
 0x8e7   : > { %v1461_v27 = vsub.f32 %v1454_v60, %v1460_v23 }
 0x8e8   : > { %v1514_v24 = vpop.xlane.xlu0 %1513 }
 0x8e9   : > { %v1515_v26 = vsub.f32 %v1508_v61, %v1514_v24  ;;  %v1462_v29 = vmul.f32 1.442695, %v1461_v27  ;;  %v2201_v24 = vld [vmem:[%s2551_s18 + $0x8] sm:$0xff]  ;;  %v2205_v27 = vld [vmem:[%s2561_s1 + $0x18] sm:$0xff] }
 0x8ea   : > { %1759 = vmatpush.bf16.msra.mxu3 %v2205_v27 }
 0x8eb   : > { %v1516_v28 = vmul.f32 1.442695, %v1515_v26  ;;  %v2200_v26 = vld [vmem:[%s2551_s18] sm:$0xff] }
 0x8ed   : > { %2286 = vpow2.f32 %v1516_v28 }
 0x8ee   : > { %2288 = vpow2.f32 %v1462_v29  ;;  %v2204_v29 = vld [vmem:[%s2561_s1 + $0x10] sm:$0xff] }
 0x8ef   : > { %1760 = vmatpush.bf16.msra.mxu3 %v2204_v29 }
 0x8f3   : > { %v2287_v30 = vpop.eup %2286 }
 0x8f4   : > { %v1518_v31 = vsel %vm1189_vm4, %v2287_v30, 0.0  ;;  %v2289_v34 = vpop.eup %2288 }
 0x8f5   : > { %1519 = vadd.xlane.f32.xlu2 %v1518_v31  ;;  %v1464_v36 = vsel %vm1189_vm4, %v2289_v34, 0.0 }
 0x8f6   : > { %v1568_v32 = vpop.xlane.xlu2 %1567 }
 0x8f7   : > { %v1569_v33 = vsub.f32 %v1562_v3, %v1568_v32  ;;  %v2198_v3 = vld [vmem:[%s2862_s29] sm:$0xff] }
 0x8f8   : > { %1643 = vmatpush.bf16.msrb.mxu1 %v2198_v3 }
 0x8f9   : > { %v1570_v35 = vmul.f32 1.442695, %v1569_v33 }
 0x8fb   : > { %2290 = vpow2.f32 %v1570_v35 }
 0x8fd   : > { %1465 = vadd.xlane.f32.xlu2 %v1464_v36 }
 0x901   : > { %v2291_v37 = vpop.eup %2290 }
 0x902   : > { %v1572_v38 = vsel %vm1189_vm4, %v2291_v37, 0.0 }
 0x903   : > { %1573 = vadd.xlane.f32.xlu1 %v1572_v38 }
 0x914   : > { %v1471_v4 = vpop.permute.xlu0 %1470 }
 0x915   : > { %1524 = vrot.lane.b32.xlu2 %v1414_v18, %s2351_s16  ;;  %1483 = vmatpush.bf16.msra.mxu0 %v1471_v4  ;;  %v1674_v4 = vperm.slane %v2672_v17, 3 }
 0x93f   : > { %v1406_v39 = vpop.xlane.xlu0 %1405 }
 0x940   : > { %2292 = vrcp.f32 %v1406_v39 }
 0x946   : > { %v2293_v40 = vpop.eup %2292 }
 0x947   : > { %v1408_v41 = vmul.f32 %v2293_v40, %v2285_v21 }
 0x949   : > { %v1409_v42 = vpack.c.bf16 %v1408_v41, %v1408_v41 }
 0x94b   : > { %2139 = vmatmul.msk.bf16.vlgmr.msrb.gmra.mxu2 %vm1189_vm4, %v1409_v42 }
 0x952   : > { %v1579_v43 = vpop.permute.xlu0 %1578 }
 0x953   : > { %1591 = vmatpush.bf16.msrb.mxu0 %v1579_v43  ;;  %v2203_v43 = vld [vmem:[%s2561_s1 + $0x8] sm:$0xff] }
 0x954   : > { %1761 = vmatpush.bf16.msra.mxu3 %v2203_v43 }
 0x968   : > { %v1520_v44 = vpop.xlane.xlu2 %1519 }
 0x969   : > { %2294 = vrcp.f32 %v1520_v44  ;;  %v2202_v44 = vld [vmem:[%s2561_s1] sm:$0xff] }
 0x96a   : > { %1762 = vmatpush.bf16.msra.mxu3 %v2202_v44 }
 0x96f   : > { %v2295_v46 = vpop.eup %2294 }
 0x970   : > { %v1466_v45 = vpop.xlane.xlu2 %1465  ;;  %v1522_v47 = vmul.f32 %v2295_v46, %v2287_v30 }
 0x971   : > { %2296 = vrcp.f32 %v1466_v45  ;;  %v2262_v45 = vld [vmem:[%s848_s14] ss:$0 sm:$0xff] }
 0x972   : > { %v1523_v51 = vpack.c.bf16 %v1522_v47, %v1522_v47 }
 0x976   : > { %v1574_v53 = vpop.xlane.xlu1 %1573 }
 0x977   : > { %v2297_v48 = vpop.eup %2296  ;;  %2298 = vrcp.f32 %v1574_v53 }
 0x978   : > { %v1468_v49 = vmul.f32 %v2297_v48, %v2289_v34  ;;  %v1525_v50 = vpop.permute.xlu2 %1524 }
 0x979   : > { %1537 = vmatpush.bf16.msra.mxu2 %v1525_v50 }
 0x97a   : > { %v1469_v52 = vpack.c.bf16 %v1468_v49, %v1468_v49 }
 0x97c   : > { %2141 = vmatmul.msk.bf16.vlgmr.msra.gmra.mxu0 %vm1189_vm4, %v1469_v52  ;;  %2143 = vmatmul.msk.bf16.vlgmr.msra.gmra.mxu2 %vm1189_vm4, %v1523_v51  ;;  %v2263_v51 = vld [vmem:[%s856_s30] ss:$0 sm:$0xff] }
 0x97d   : > { %v2299_v54 = vpop.eup %2298  ;;  %1706 = vmatpush.bf16.msrb.mxu2 %v2201_v24 }
 0x97e   : > { %v1576_v55 = vmul.f32 %v2299_v54, %v2291_v37  ;;  %v1672_v37 = vperm.slane %v2672_v17, 2 }
 0x980   : > { %v1577_v56 = vpack.c.bf16 %v1576_v55, %v1576_v55 }
 0x981   : > { %1707 = vmatpush.bf16.msrb.mxu2 %v2200_v26 }
 0x98c   : > { %2145 = vmatmul.msk.bf16.vlgmr.msrb.gmra.mxu0 %vm1189_vm4, %v1577_v56 }
 0x9ce   : > { %v1428_v57 = vpop.f32.mrf.mxu2 }
 0x9d6   : > { %v1430_v58 = vpop.f32.mrf.mxu2 }
 0x9f9   : > { %v1485_v59 = vpop.f32.mrf.mxu0 }
 0x9fa   : > { %1598 = vrot.lane.b32.xlu0 %v1485_v59, %s2354_s4  ;;  %s2869_s4 = scalar_lea.vmem (!%p2181_p9), %s2868_s12, %s2485_s21 }
 0x9ff   : > { %v1539_v60 = vpop.f32.mrf.mxu2 }
 0xa01   : > { %v1487_v2 = vpop.f32.mrf.mxu0 }
 0xa02   : > { %1602 = vrot.lane.b32.xlu0 %v1539_v60, %s2355_s20 }
 0xa07   : > { %v1541_v61 = vpop.f32.mrf.mxu2 }
 0xa09   : > { %v1593_v63 = vpop.f32.mrf.mxu0 }
 0xa0a   : > { %1606 = vrot.lane.b32.xlu2 %v1593_v63, %s2356_s23 }
 0xa11   : > { %v1595_v0 = vpop.f32.mrf.mxu0 }
 0xa64   : > { %v1607_v8 = vpop.permute.xlu2 %1606 }
 0xa6c   : > { %v1599_v5 = vpop.permute.xlu0 %1598 }
 0xa6d   : > { %v1609_v6 = vsel %vm950_vm2, %v1428_v57, %v1599_v5 }
 0xa74   : > { %v1603_v7 = vpop.permute.xlu0 %1602 }
 0xa75   : > { %v1610_v9 = vsel %vm1189_vm4, %v1609_v6, %v1603_v7 }
 0xa76   : > { %v1611_v10 = vsel %vm1191_vm5, %v1610_v9, %v1607_v8  ;;  %v1791_v9 = vperm.slane %v2672_v17, 4 }
 0xa77   : > { %v1612_v11 = vpack.c.bf16 %v1611_v10, %v1611_v10 }
 0xa79   : > { %2154 = vmatmul.msk.bf16.vlgmr.msrb.gmra.mxu1 %vm899_vm1, %v1612_v11  ;;  %v1793_v11 = vperm.slane %v2672_v17, 5 }
 0xaf6   : > { %v1645_v13 = vpop.f32.mrf.mxu1 }
 0xaf7   : > { %v1646_v14 = vadd.f32 %v2261_v12, %v1645_v13 }
 0xaf9   : > { %v1649_v15 = vadd.f32 %v1646_v14, %v2676_v25 }
 0xafb   : > { %v1650_v16 = vsel %vm899_vm1, %v1649_v15, 0.0 }
 0xafc   : > { %1651 = vadd.xlane.f32.xlu0 %v1650_v16 }
 0xafe   : > { %v1647_v18 = vpop.f32.mrf.mxu1 }
 0xb6f   : > { %v1652_v19 = vpop.xlane.xlu0 %1651 }
 0xb70   : > { %v1653_v20 = vmul.f32 %v1652_v19, %v2655_v62 }
 0xb72   : > { %v1654_v21 = vsub.f32 %v1649_v15, %v1653_v20 }
 0xb74   : > { %v1655_v22 = vmul.f32 %v1654_v21, %v1654_v21 }
 0xb76   : > { %v1656_v23 = vsel %vm899_vm1, %v1655_v22, 0.0 }
 0xb77   : > { %1657 = vadd.xlane.f32.xlu2 %v1656_v23 }
 0xbea   : > { %v1658_v28 = vpop.xlane.xlu2 %1657 }
 0xbeb   : > { %v1659_v25 = vmul.f32 %v1658_v28, %v2655_v62 }
 0xbed   : > { %v1660_v30 = vadd.f32 1e-05, %v1659_v25 }
 0xbef   : > { %2300 = vrsqrt.f32 %v1660_v30  ;;  %vm1667_vm11 = vweird.f32 %v1660_v30 }
 0xbf5   : > { %v2301_v31 = vpop.eup %2300 }
 0xbf6   : > { %v1662_v32 = vmul.f32 %v2301_v31, %v1660_v30  ;;  %vm1668_vm10 = vweird.f32 %v2301_v31 }
 0xbf7   : > { %vm1669_vm12 = vmor %vm1667_vm11, %vm1668_vm10 }
 0xbf8   : > { %v1663_v33 = vmul.f32 %v2301_v31, %v1662_v32 }
 0xbfa   : > { %v1664_v34 = vmul.f32 0.5, %v1663_v33 }
 0xbfc   : > { %v1665_v35 = vsub.f32 1.5, %v1664_v34 }
 0xbfe   : > { %v1666_v36 = vmul.f32 %v2301_v31, %v1665_v35 }
 0xc00   : > { %v1670_v38 = vsel %vm1669_vm12, %v2301_v31, %v1666_v36 }
 0xc01   : > { %v1671_v39 = vmul.f32 %v1670_v38, %v1654_v21 }
 0xc03   : > { %v1673_v40 = vmul.f32 %v1672_v37, %v1671_v39 }
 0xc05   : > { %v1675_v41 = vadd.f32 %v1674_v4, %v1673_v40 }
 0xc07   : > { %v1676_v42 = vpack.c.bf16 %v1675_v41, %v1675_v41 }
 0xc09   : > { %2163 = vmatmul.msk.bf16.vlgmr.msrb.gmra.mxu2 %vm899_vm1, %v1676_v42 }
 0xc8c   : > { %v1709_v46 = vpop.f32.mrf.mxu2 }
 0xc8d   : > { %v1710_v47 = vadd.f32 %v2262_v45, %v1709_v46 }
 0xc8f   : > { %v1713_v48 = vmax.f32 %v1710_v47, 0.0 }
 0xc91   : > { %v1714_v49 = vpack.c.bf16 %v1713_v48, %v1713_v48 }
 0xc93   : > { %2180 = vmatmul.msk.bf16.vlgmr.msra.gmra.mxu3 %vm1751_vm13, %v1714_v49 }
 0xc94   : > { %v1711_v50 = vpop.f32.mrf.mxu2 }
 0xd16   : > { %v1764_v52 = vpop.f32.mrf.mxu3 }
 0xd17   : > { %v1765_v53 = vadd.f32 %v2263_v51, %v1764_v52 }
 0xd19   : > { %v1768_v54 = vadd.f32 %v1765_v53, %v1675_v41 }
 0xd1b   : > { %v1769_v55 = vsel %vm899_vm1, %v1768_v54, 0.0 }
 0xd1c   : > { %1770 = vadd.xlane.f32.xlu1 %v1769_v55 }
 0xd1e   : > { %v1766_v56 = vpop.f32.mrf.mxu3 }
 0xd8f   : > { %v1771_v57 = vpop.xlane.xlu1 %1770 }
 0xd90   : > { %v1772_v58 = vmul.f32 %v1771_v57, %v2655_v62 }
 0xd92   : > { %v1773_v59 = vsub.f32 %v1768_v54, %v1772_v58 }
 0xd94   : > { %v1774_v60 = vmul.f32 %v1773_v59, %v1773_v59 }
 0xd96   : > { %v1775_v2 = vsel %vm899_vm1, %v1774_v60, 0.0 }
 0xd97   : > { %1776 = vadd.xlane.f32.xlu1 %v1775_v2 }
 0xe0a   : > { %v1777_v61 = vpop.xlane.xlu1 %1776 }
 0xe0b   : > { %v1778_v63 = vmul.f32 %v1777_v61, %v2655_v62 }
 0xe0d   : > { %v1779_v0 = vadd.f32 1e-05, %v1778_v63 }
 0xe0f   : > { %2302 = vrsqrt.f32 %v1779_v0  ;;  %vm1786_vm15 = vweird.f32 %v1779_v0 }
 0xe15   : > { %v2303_v1 = vpop.eup %2302 }
 0xe16   : > { %v1781_v3 = vmul.f32 %v2303_v1, %v1779_v0  ;;  %vm1787_vm14 = vweird.f32 %v2303_v1 }
 0xe17   : > { %vm1788_vm0 = vmor %vm1786_vm15, %vm1787_vm14 }
 0xe18   : > { %v1782_v5 = vmul.f32 %v2303_v1, %v1781_v3 }
 0xe1a   : > { %v1783_v6 = vmul.f32 0.5, %v1782_v5 }
 0xe1c   : > { %v1784_v7 = vsub.f32 1.5, %v1783_v6 }
 0xe1e   : > { %v1785_v8 = vmul.f32 %v2303_v1, %v1784_v7 }
 0xe20   : > { %v1789_v10 = vsel %vm1788_vm0, %v2303_v1, %v1785_v8 }
 0xe21   : > { %v1790_v12 = vmul.f32 %v1789_v10, %v1773_v59 }
 0xe23   : > { %v1792_v13 = vmul.f32 %v1791_v9, %v1790_v12  ;;  %1799 = sbr.rel (%p2181_p9) target bundleno = 3893 (0xf35), region = 100 }
 0xe25   : > { %v1794_v14 = vadd.f32 %v1793_v11, %v1792_v13 }
 0xe27   : > { %1795 = vst.msk [vmem:[#allocation2] sm:$0xff] %vm899_vm1, %v1794_v14 }
 0xe28   : > { %v1801_v15 = vsel %vm899_vm1, %v1794_v14, 0.0  ;;  %v1800_v25 = vld [vmem:[%s2867_s22] sm:$0x3] }
 0xe29   : > { %1802 = vadd.xlane.f32.xlu0 %v1801_v15  ;;  %v1823_v31 = vperm.slane %v1800_v25, 0 }
 0xe9c   : > { %v1803_v16 = vpop.xlane.xlu0 %1802 }
 0xe9d   : > { %v1804_v18 = vmul.f32 %v1803_v16, %v2655_v62 }
 0xe9f   : > { %v1805_v19 = vsub.f32 %v1794_v14, %v1804_v18 }
 0xea1   : > { %v1806_v20 = vmul.f32 %v1805_v19, %v1805_v19 }
 0xea3   : > { %v1807_v21 = vsel %vm899_vm1, %v1806_v20, 0.0 }
 0xea4   : > { %1808 = vadd.xlane.f32.xlu0 %v1807_v21 }
 0xf17   : > { %v1809_v17 = vpop.xlane.xlu0 %1808 }
 0xf18   : > { %v1810_v22 = vmul.f32 %v1809_v17, %v2655_v62  ;;  %v1825_v62 = vperm.slane %v1800_v25, 1 }
 0xf1a   : > { %v1811_v23 = vadd.f32 1e-05, %v1810_v22 }
 0xf1c   : > { %2304 = vrsqrt.f32 %v1811_v23  ;;  %vm1818_vm3 = vweird.f32 %v1811_v23 }
 0xf22   : > { %v2305_v24 = vpop.eup %2304 }
 0xf23   : > { %v1813_v26 = vmul.f32 %v2305_v24, %v1811_v23  ;;  %vm1819_vm2 = vweird.f32 %v2305_v24 }
 0xf24   : > { %vm1820_vm4 = vmor %vm1818_vm3, %vm1819_vm2 }
 0xf25   : > { %v1814_v27 = vmul.f32 %v2305_v24, %v1813_v26 }
 0xf27   : > { %v1815_v28 = vmul.f32 0.5, %v1814_v27 }
 0xf29   : > { %v1816_v29 = vsub.f32 1.5, %v1815_v28 }
 0xf2b   : > { %v1817_v30 = vmul.f32 %v2305_v24, %v1816_v29 }
 0xf2d   : > { %v1821_v32 = vsel %vm1820_vm4, %v2305_v24, %v1817_v30 }
 0xf2e   : > { %v1822_v33 = vmul.f32 %v1821_v32, %v1805_v19 }
 0xf30   : > { %v1824_v34 = vmul.f32 %v1823_v31, %v1822_v33 }
 0xf32   : > { %v1826_v35 = vadd.f32 %v1825_v62, %v1824_v34 }
 0xf34   : > { %1827 = vst.msk [vmem:[%s2869_s4] sm:$0xff] %vm899_vm1, %v1826_v35 }
 0xf35 PF: > { %s2870_s20 = sld [smem:[#allocation5_spill]] }
 0xf36   : > { %s2871_s27 = sld [smem:[#allocation3_spill]] }
 0xf37   : > { %s2872_s28 = sld [smem:[#allocation4_spill]] }
 0xf38   : > { %s2873_s29 = sld [smem:[#allocation6_spill]] }
 0xf39   : > { %s2874_s30 = sld [smem:[#allocation7_spill]] }
 0xf3b   : > { %s28_s0 = sadd.s32 1, %s2870_s20  }
 0xf3c   : > { %p25_p10 = scmp.ge.s32.totalorder %s28_s0, 6  }
 0xf3e   :  { %27 = sbr.rel (!%p25_p10) target bundleno = 18 (0x12), region = 178 }

</bundles_post_ra>
